<compile_context>
chip_gen: v6e
topology: v6e:2x2x1
jax: 0.10.0
libtpu: 0.0.40
codegen_flags: <defaults>
</compile_context>

<pallas_src>
import functools

import jax
import jax.numpy as jnp
import numpy as np
from jax.experimental import pallas as pl
from jax.experimental.pallas import tpu as pltpu


def _round_up(x, m):
    return ((x + m - 1) // m) * m


def attn_decoder_kernel(
    scope_in_ref,   # (B, L, 2H)  [embedded | encoder_outputs]
    h_ref,          # (B, H)      hidden[0][0] per sample
    c_ref,          # (B, H)      hidden[1][0] per sample
    ws_ref,         # (B, WSP)    world_state (zero-padded lanes)
    wm_ref,         # (R, C1)     packed H-wide weight sections (resident VMEM)
    wo_ref,         # (H, O_pad)  out-projection weight (resident VMEM)
    bp_ref,         # (8, CB)     packed biases (+ transform_beta weight row)
    out_ref,        # (B, OUT_W)  lane-packed [logp | pad | h | c | attn | pad]
    *,
    B, L, H, WSP, O, O_pad, offs,
):
    f32 = jnp.float32
    o_ihc, o_dense, o_dec, o_lstm, o_lin = offs

    h = h_ref[...]                      # (B, H)
    c = c_ref[...]                      # (B, H)
    ws = ws_ref[...]                    # (B, WSP)
    bp = bp_ref[...]                    # (8, CB)

    def mm(a, w):
        return jnp.dot(a, w, preferred_element_type=f32)

    # scope_attr = input_hidden_combine(cat(embedded, encoder_outputs, dim=1))
    # for the WHOLE batch in one (B*L, 2H) @ (2H, H) MXU matmul.
    scope_flat = scope_in_ref[...].reshape(B * L, 2 * H)
    scope_attr = (mm(scope_flat, wm_ref[o_ihc:o_ihc + 2 * H, :H])
                  + bp[0:1, :H]).reshape(B, L, H)

    # beta = transform_beta(tanh(scope_attr + hidden[0][0]))
    # done on the VPU/XLU: broadcast weight row + lane reduce (no MXU trip).
    t = jnp.tanh(scope_attr + h[:, None, :])                 # (B, L, H)
    w_beta_row = bp[7:8, :H]                                 # (1, H)
    beta = jnp.sum(t * w_beta_row[None, :, :], axis=2) + bp[1:2, 0:1]   # (B, L)

    # attn_weights1 = softmax(beta, dim=0)  (padded rows included, as in PyTorch)
    mx = jnp.max(beta, axis=1, keepdims=True)
    e = jnp.exp(beta - mx)
    attn = e / jnp.sum(e, axis=1, keepdims=True)             # (B, L)

    # zt = bmm(attn^T, scope_attr) as a weighted sublane reduction -> (B, H)
    zt = jnp.sum(attn[:, :, None] * scope_attr, axis=1)

    # world_state = dense(world_state); ws lanes and w_dense rows >= Ws are
    # both zero-padded (see pack_params / wrapper), so contraction is exact.
    ws_d = mm(ws, wm_ref[o_dense:o_dense + WSP, :H]) + bp[2:3, :H]      # (B, H)

    # x = decoder_input(cat(zt, world_state, hidden[0][0]))  -> (B,3H)@(3H,H)
    dec_in = jnp.concatenate([zt, ws_d, h], axis=1)
    x = mm(dec_in, wm_ref[o_dec:o_dec + 3 * H, :H]) + bp[3:4, :H]       # (B, H)

    # single nn.LSTM step: all 4 gates in ONE (B,2H)@(2H,4H) matmul (i,f,g,o)
    lstm_in = jnp.concatenate([x, h], axis=1)
    gates = mm(lstm_in, wm_ref[o_lstm:o_lstm + 2 * H, :4 * H]) + bp[4:5, :4 * H]
    gi = jax.nn.sigmoid(gates[:, 0:H])
    gf = jax.nn.sigmoid(gates[:, H:2 * H])
    gg = jnp.tanh(gates[:, 2 * H:3 * H])
    go = jax.nn.sigmoid(gates[:, 3 * H:4 * H])
    c_new = gf * c + gi * gg
    h_new = go * jnp.tanh(c_new)

    # output_ctx_combine = linear(cat(lstm_out, zt))  -> (B,2H)@(2H,H)
    lin_in = jnp.concatenate([h_new, zt], axis=1)
    out_ctx = mm(lin_in, wm_ref[o_lin:o_lin + 2 * H, :H]) + bp[5:6, :H]

    # qt = out(world_state + output_ctx_combine); log_softmax(dim=1)
    qt = mm(ws_d + out_ctx, wo_ref[...])[:, :O] + bp[6:7, :O]           # (B, O)
    m2 = jnp.max(qt, axis=1, keepdims=True)
    s = qt - m2
    logp = s - jnp.log(jnp.sum(jnp.exp(s), axis=1, keepdims=True))

    # Lane-packed output slab: [logp | pad->O_pad | h | c | attn | pad]
    out_ref[...] = jnp.zeros_like(out_ref)
    out_ref[:, :O] = logp
    out_ref[:, O_pad:O_pad + H] = h_new
    out_ref[:, O_pad + H:O_pad + 2 * H] = c_new
    out_ref[:, O_pad + 2 * H:O_pad + 2 * H + L] = attn


def init_params(key, input_size, hidden_size, world_state_size, output_size):
    H = hidden_size
    ks = jax.random.split(key, 32)

    def u(k, shape, fan_in):
        bound = 1.0 / np.sqrt(fan_in)
        return jax.random.uniform(k, shape, jnp.float32, -bound, bound)

    p = {}
    p["embedding"] = jax.random.normal(ks[0], (input_size, H), jnp.float32) * 0.1
    p["w_ihc_e"] = u(ks[1], (H, H), 2 * H)
    p["w_ihc_x"] = u(ks[2], (H, H), 2 * H)
    p["b_ihc"] = u(ks[3], (1, H), 2 * H)
    p["w_beta"] = u(ks[4], (H, 1), H)
    p["b_beta"] = u(ks[5], (1, 1), H)
    p["w_dense"] = u(ks[6], (world_state_size, H), world_state_size)
    p["b_dense"] = u(ks[7], (1, H), world_state_size)
    p["w_dec_z"] = u(ks[8], (H, H), 3 * H)
    p["w_dec_w"] = u(ks[9], (H, H), 3 * H)
    p["w_dec_h"] = u(ks[10], (H, H), 3 * H)
    p["b_dec"] = u(ks[11], (1, H), 3 * H)
    for gi, g in enumerate(["i", "f", "g", "o"]):
        p[f"w_ih_{g}"] = u(ks[12 + 3 * gi], (H, H), H)
        p[f"w_hh_{g}"] = u(ks[13 + 3 * gi], (H, H), H)
        p[f"b_{g}"] = u(ks[14 + 3 * gi], (1, H), H)   # b_ih + b_hh folded
    p["w_lin_o"] = u(ks[24], (H, H), 2 * H)
    p["w_lin_z"] = u(ks[25], (H, H), 2 * H)
    p["b_lin"] = u(ks[26], (1, H), 2 * H)
    p["w_out"] = u(ks[27], (H, output_size), H)
    p["b_out"] = u(ks[28], (1, output_size), H)
    return p


def pack_params(params, hidden_size, world_state_size, output_size):
    """Pack weights into: (R, C1) slab of H-wide sections, (H, O_pad) w_out slab,
    and an (8, CB) bias slab (row 7 holds transform_beta's weight as a lane row)."""
    H, Ws, O = hidden_size, world_state_size, output_size
    C1 = _round_up(4 * H, 128)            # widest H-based section (LSTM gates)
    CO = _round_up(O, 128)                # w_out kept separate (v7x VMEM scaling)
    CB = max(C1, CO)
    WSP = _round_up(Ws, 8)                # keeps all row offsets sublane-aligned

    w_ihc = jnp.concatenate([params["w_ihc_e"], params["w_ihc_x"]], axis=0)            # (2H, H)
    w_dense = jnp.pad(params["w_dense"], ((0, WSP - Ws), (0, 0)))                      # (WSP, H) zero rows
    w_dec = jnp.concatenate(
        [params["w_dec_z"], params["w_dec_w"], params["w_dec_h"]], axis=0)             # (3H, H)
    w_lstm = jnp.concatenate(
        [jnp.concatenate([params[f"w_ih_{g}"] for g in "ifgo"], axis=1),
         jnp.concatenate([params[f"w_hh_{g}"] for g in "ifgo"], axis=1)], axis=0)      # (2H, 4H)
    w_lin = jnp.concatenate([params["w_lin_o"], params["w_lin_z"]], axis=0)            # (2H, H)

    sections = [w_ihc, w_dense, w_dec, w_lstm, w_lin]
    offs, r = [], 0
    for s in sections:
        offs.append(r)
        r += s.shape[0]
    w_main = jnp.concatenate(
        [jnp.pad(s, ((0, 0), (0, C1 - s.shape[1]))) for s in sections], axis=0)        # (R, C1)

    w_out = jnp.pad(params["w_out"], ((0, 0), (0, CO - O)))                            # (H, CO)

    b_lstm = jnp.concatenate([params[f"b_{g}"] for g in "ifgo"], axis=1)               # (1, 4H)
    bias_rows = [params["b_ihc"], params["b_beta"], params["b_dense"], params["b_dec"],
                 b_lstm, params["b_lin"], params["b_out"],
                 params["w_beta"].T]                                                   # row 7: beta weight row
    b_pack = jnp.concatenate(
        [jnp.pad(b, ((0, 0), (0, CB - b.shape[1]))) for b in bias_rows], axis=0)       # (8, CB)

    return (w_main.astype(jnp.float32), w_out.astype(jnp.float32),
            b_pack.astype(jnp.float32), tuple(offs), WSP)


def attn_decoder_forward(params, input_ids, world_state, hidden, encoder_outputs,
                         max_length):
    """Batched single decoder step: the whole batch in ONE pallas_call (no grid).

    input_ids       : (B, SEQ) int32
    world_state     : (B, Ws)
    hidden          : (h, c), each (B, H)
    encoder_outputs : (B, max_length, H)
    """
    H = params["w_ihc_e"].shape[0]
    O = params["w_out"].shape[1]
    Ws = params["w_dense"].shape[0]
    B, SEQ = input_ids.shape
    L = max_length

    w_main, w_out, b_pack, offs, WSP = pack_params(params, H, Ws, O)
    O_pad = _round_up(O, 128)
    OUT_W = _round_up(O_pad + 2 * H + L, 128)

    # Wrapper glue: embedding gather, zero-pad to max_length (the Python loop
    # in the PyTorch forward), lane-concat with encoder_outputs.  The concat
    # costs one extra HBM copy of encoder_outputs — negligible at these sizes;
    # at production L/H pass them separately and accumulate two matmuls.
    embed = jnp.take(params["embedding"], input_ids, axis=0)                 # (B, SEQ, H)
    embedded = jnp.zeros((B, L, H), jnp.float32).at[:, :SEQ].set(embed)
    scope_in = jnp.concatenate(
        [embedded, encoder_outputs.astype(jnp.float32)], axis=-1)            # (B, L, 2H)

    h0 = hidden[0].reshape(B, H).astype(jnp.float32)
    c0 = hidden[1].reshape(B, H).astype(jnp.float32)
    # ws lanes >= Ws are zero (and w_dense rows >= Ws are zero in pack_params).
    ws = jnp.zeros((B, WSP), jnp.float32).at[:, :Ws].set(
        world_state.reshape(B, Ws).astype(jnp.float32))

    kernel = functools.partial(attn_decoder_kernel, B=B, L=L, H=H, WSP=WSP,
                               O=O, O_pad=O_pad, offs=offs)

    # No grid -> no pipelining: every operand is a whole-array, single-buffered
    # resident VMEM ref (weights are not double-buffered).
    vmem = pl.BlockSpec(memory_space=pltpu.MemorySpace.VMEM)
    out = pl.pallas_call(
        kernel,
        out_shape=jax.ShapeDtypeStruct((B, OUT_W), jnp.float32),
        in_specs=[vmem] * 7,
        out_specs=vmem,
    )(scope_in, h0, c0, ws, w_main, w_out, b_pack)

    logp = out[:, :O]
    h_new = out[:, O_pad:O_pad + H]
    c_new = out[:, O_pad + H:O_pad + 2 * H]
    attn1 = out[:, O_pad + 2 * H:O_pad + 2 * H + L].reshape(B, L, 1)
    return logp, (h_new, c_new), attn1


def attn_decoder_reference(params, input_ids, world_state, hidden, encoder_outputs,
                           max_length):
    """Pure-JAX per-sample reference mirroring the PyTorch forward (HIGHEST precision)."""
    HI = jax.lax.Precision.HIGHEST

    def mm(a, w):
        return jnp.dot(a, w, precision=HI)

    H = params["w_ihc_e"].shape[0]
    embed = jnp.take(params["embedding"], input_ids, axis=0)
    embedded = jnp.zeros((max_length, H), jnp.float32).at[: input_ids.shape[0]].set(embed)
    h = hidden[0].reshape(1, H)
    c = hidden[1].reshape(1, H)
    ws = world_state.reshape(1, -1)

    scope_attr = mm(embedded, params["w_ihc_e"]) + mm(encoder_outputs, params["w_ihc_x"]) + params["b_ihc"]
    beta = mm(jnp.tanh(scope_attr + h), params["w_beta"]) + params["b_beta"]
    attn1 = jax.nn.softmax(beta, axis=0)
    zt = mm(attn1.T, scope_attr)
    ws_d = mm(ws, params["w_dense"]) + params["b_dense"]
    x = mm(zt, params["w_dec_z"]) + mm(ws_d, params["w_dec_w"]) + mm(h, params["w_dec_h"]) + params["b_dec"]
    gi = jax.nn.sigmoid(mm(x, params["w_ih_i"]) + mm(h, params["w_hh_i"]) + params["b_i"])
    gf = jax.nn.sigmoid(mm(x, params["w_ih_f"]) + mm(h, params["w_hh_f"]) + params["b_f"])
    gg = jnp.tanh(mm(x, params["w_ih_g"]) + mm(h, params["w_hh_g"]) + params["b_g"])
    go = jax.nn.sigmoid(mm(x, params["w_ih_o"]) + mm(h, params["w_hh_o"]) + params["b_o"])
    c_new = gf * c + gi * gg
    h_new = go * jnp.tanh(c_new)
    out_ctx = mm(h_new, params["w_lin_o"]) + mm(zt, params["w_lin_z"]) + params["b_lin"]
    qt = mm(ws_d + out_ctx, params["w_out"]) + params["b_out"]
    logp = jax.nn.log_softmax(qt, axis=1)
    return logp, (h_new, c_new), attn1


if __name__ == "__main__":
    INPUT_SIZE = 50     # vocab
    HIDDEN = 32
    WORLD = 24          # world_state_size
    OUTPUT = 40         # output_size
    MAX_LEN = 16        # max_length (module default is 46; small for the demo)
    SEQ = 8             # number of input tokens (< MAX_LEN)
    BATCH = 8           # independent decoder steps, batched into one matmul M dim

    key = jax.random.PRNGKey(0)
    kp, ki, kw, ke, kh, kc = jax.random.split(key, 6)
    params = init_params(kp, INPUT_SIZE, HIDDEN, WORLD, OUTPUT)

    input_ids = jax.random.randint(ki, (BATCH, SEQ), 0, INPUT_SIZE)
    world_state = jax.random.normal(kw, (BATCH, WORLD), jnp.float32)
    encoder_outputs = jax.random.normal(ke, (BATCH, MAX_LEN, HIDDEN), jnp.float32)
    h0 = jax.random.normal(kh, (BATCH, HIDDEN), jnp.float32) * 0.1
    c0 = jax.random.normal(kc, (BATCH, HIDDEN), jnp.float32) * 0.1

    logp, (h_new, c_new), attn1 = attn_decoder_forward(
        params, input_ids, world_state, (h0, c0), encoder_outputs, MAX_LEN)
    jax.block_until_ready((logp, h_new, c_new, attn1))

    # Per-sample correctness check against the PyTorch-faithful reference.
    for b in range(BATCH):
        hid_b = (h0[b].reshape(1, 1, HIDDEN), c0[b].reshape(1, 1, HIDDEN))
        ref_logp, (ref_h, ref_c), ref_attn = attn_decoder_reference(
            params, input_ids[b], world_state[b].reshape(1, WORLD), hid_b,
            encoder_outputs[b], MAX_LEN)
        np.testing.assert_allclose(np.asarray(logp[b:b + 1]), np.asarray(ref_logp),
                                   atol=5e-4, rtol=5e-4)
        np.testing.assert_allclose(np.asarray(h_new[b:b + 1]), np.asarray(ref_h),
                                   atol=5e-4, rtol=5e-4)
        np.testing.assert_allclose(np.asarray(c_new[b:b + 1]), np.asarray(ref_c),
                                   atol=5e-4, rtol=5e-4)
        np.testing.assert_allclose(np.asarray(attn1[b]), np.asarray(ref_attn),
                                   atol=5e-4, rtol=5e-4)

    # TODO(synk): nn.Dropout, self.attn and self.attn_combine are constructed in
    # __init__ but never used in forward(), so they are intentionally omitted.
    print("KERNEL_OK")
</pallas_src>

<mosaic_0001>
module attributes {stable_mosaic.version = 11 : i64} {
  func.func @attn_decoder_kernel(%arg0: memref<8x16x64xf32, #tpu.memory_space<vmem>>, %arg1: memref<8x32xf32, #tpu.memory_space<vmem>>, %arg2: memref<8x32xf32, #tpu.memory_space<vmem>>, %arg3: memref<8x24xf32, #tpu.memory_space<vmem>>, %arg4: memref<312x128xf32, #tpu.memory_space<vmem>>, %arg5: memref<32x128xf32, #tpu.memory_space<vmem>>, %arg6: memref<8x128xf32, #tpu.memory_space<vmem>>, %arg7: memref<8x256xf32, #tpu.memory_space<vmem>>) attributes {dimension_semantics = [], scalar_prefetch = 0 : i64, scratch_operands = 0 : i64, tpu.core_type = #tpu.core_type<tc>} {
    %c0 = arith.constant 0 : index
    %c0_0 = arith.constant 0 : index
    %0 = vector.load %arg1[%c0, %c0_0] : memref<8x32xf32, #tpu.memory_space<vmem>>, vector<8x32xf32>
    %c0_1 = arith.constant 0 : index
    %c0_2 = arith.constant 0 : index
    %1 = vector.load %arg2[%c0_1, %c0_2] : memref<8x32xf32, #tpu.memory_space<vmem>>, vector<8x32xf32>
    %c0_3 = arith.constant 0 : index
    %c0_4 = arith.constant 0 : index
    %2 = vector.load %arg3[%c0_3, %c0_4] : memref<8x24xf32, #tpu.memory_space<vmem>>, vector<8x24xf32>
    %c0_5 = arith.constant 0 : index
    %c0_6 = arith.constant 0 : index
    %3 = vector.load %arg6[%c0_5, %c0_6] : memref<8x128xf32, #tpu.memory_space<vmem>>, vector<8x128xf32>
    %c0_7 = arith.constant 0 : index
    %c0_8 = arith.constant 0 : index
    %c0_9 = arith.constant 0 : index
    %4 = vector.load %arg0[%c0_7, %c0_8, %c0_9] : memref<8x16x64xf32, #tpu.memory_space<vmem>>, vector<8x16x64xf32>
    %5 = vector.shape_cast %4 : vector<8x16x64xf32> to vector<128x64xf32>
    %c0_10 = arith.constant 0 : index
    %c0_11 = arith.constant 0 : index
    %6 = vector.load %arg4[%c0_10, %c0_11] : memref<312x128xf32, #tpu.memory_space<vmem>>, vector<64x32xf32>
    %cst = arith.constant dense<0.000000e+00> : vector<128x32xf32>
    %7 = tpu.matmul %5, %6, %cst {dimension_numbers = #tpu.dot_dimension_numbers<[1], [0], [0], [1], [0, 0, 1, 1], [], []>} : vector<128x64xf32>, vector<64x32xf32>, vector<128x32xf32> -> vector<128x32xf32>
    %8 = vector.extract_strided_slice %3 {offsets = [0, 0], sizes = [1, 32], strides = [1, 1]} : vector<8x128xf32> to vector<1x32xf32>
    %9 = vector.broadcast %8 : vector<1x32xf32> to vector<128x32xf32>
    %10 = arith.addf %7, %9 : vector<128x32xf32>
    %11 = vector.shape_cast %10 : vector<128x32xf32> to vector<8x16x32xf32>
    %12 = vector.shape_cast %0 : vector<8x32xf32> to vector<8x1x32xf32>
    %13 = vector.broadcast %12 : vector<8x1x32xf32> to vector<8x16x32xf32>
    %14 = arith.addf %11, %13 : vector<8x16x32xf32>
    %15 = math.tanh %14 : vector<8x16x32xf32>
    %16 = vector.extract_strided_slice %3 {offsets = [7, 0], sizes = [1, 32], strides = [1, 1]} : vector<8x128xf32> to vector<1x32xf32>
    %17 = vector.shape_cast %16 : vector<1x32xf32> to vector<1x1x32xf32>
    %18 = vector.broadcast %17 : vector<1x1x32xf32> to vector<8x16x32xf32>
    %19 = arith.mulf %15, %18 : vector<8x16x32xf32>
    %cst_12 = arith.constant dense<0.000000e+00> : vector<8x16xf32>
    %20 = vector.multi_reduction <add>, %19, %cst_12 [2] : vector<8x16x32xf32> to vector<8x16xf32>
    %21 = vector.extract_strided_slice %3 {offsets = [1, 0], sizes = [1, 1], strides = [1, 1]} : vector<8x128xf32> to vector<1x1xf32>
    %22 = vector.broadcast %21 : vector<1x1xf32> to vector<8x16xf32>
    %23 = arith.addf %20, %22 : vector<8x16xf32>
    %cst_13 = arith.constant dense<0xFF800000> : vector<8xf32>
    %24 = vector.multi_reduction <maximumf>, %23, %cst_13 [1] : vector<8x16xf32> to vector<8xf32>
    %25 = vector.shape_cast %24 : vector<8xf32> to vector<8x1xf32>
    %26 = vector.broadcast %25 : vector<8x1xf32> to vector<8x16xf32>
    %27 = arith.subf %23, %26 : vector<8x16xf32>
    %28 = math.exp %27 : vector<8x16xf32>
    %cst_14 = arith.constant dense<0.000000e+00> : vector<8xf32>
    %29 = vector.multi_reduction <add>, %28, %cst_14 [1] : vector<8x16xf32> to vector<8xf32>
    %30 = vector.shape_cast %29 : vector<8xf32> to vector<8x1xf32>
    %31 = vector.broadcast %30 : vector<8x1xf32> to vector<8x16xf32>
    %32 = arith.divf %28, %31 : vector<8x16xf32>
    %33 = vector.shape_cast %32 : vector<8x16xf32> to vector<8x16x1xf32>
    %34 = vector.broadcast %33 : vector<8x16x1xf32> to vector<8x16x32xf32>
    %35 = arith.mulf %34, %11 : vector<8x16x32xf32>
    %cst_15 = arith.constant dense<0.000000e+00> : vector<8x32xf32>
    %36 = vector.multi_reduction <add>, %35, %cst_15 [1] : vector<8x16x32xf32> to vector<8x32xf32>
    %c64 = arith.constant 64 : index
    %c0_16 = arith.constant 0 : index
    %37 = vector.load %arg4[%c64, %c0_16] : memref<312x128xf32, #tpu.memory_space<vmem>>, vector<24x32xf32>
    %cst_17 = arith.constant dense<0.000000e+00> : vector<8x32xf32>
    %38 = tpu.matmul %2, %37, %cst_17 {dimension_numbers = #tpu.dot_dimension_numbers<[1], [0], [0], [1], [0, 0, 1, 1], [], []>} : vector<8x24xf32>, vector<24x32xf32>, vector<8x32xf32> -> vector<8x32xf32>
    %39 = vector.extract_strided_slice %3 {offsets = [2, 0], sizes = [1, 32], strides = [1, 1]} : vector<8x128xf32> to vector<1x32xf32>
    %40 = vector.broadcast %39 : vector<1x32xf32> to vector<8x32xf32>
    %41 = arith.addf %38, %40 : vector<8x32xf32>
    %42 = tpu.concatenate %36, %41, %0 in 1 : vector<8x32xf32>, vector<8x32xf32>, vector<8x32xf32> -> vector<8x96xf32>
    %c88 = arith.constant 88 : index
    %c0_18 = arith.constant 0 : index
    %43 = vector.load %arg4[%c88, %c0_18] : memref<312x128xf32, #tpu.memory_space<vmem>>, vector<96x32xf32>
    %cst_19 = arith.constant dense<0.000000e+00> : vector<8x32xf32>
    %44 = tpu.matmul %42, %43, %cst_19 {dimension_numbers = #tpu.dot_dimension_numbers<[1], [0], [0], [1], [0, 0, 1, 1], [], []>} : vector<8x96xf32>, vector<96x32xf32>, vector<8x32xf32> -> vector<8x32xf32>
    %45 = vector.extract_strided_slice %3 {offsets = [3, 0], sizes = [1, 32], strides = [1, 1]} : vector<8x128xf32> to vector<1x32xf32>
    %46 = vector.broadcast %45 : vector<1x32xf32> to vector<8x32xf32>
    %47 = arith.addf %44, %46 : vector<8x32xf32>
    %48 = tpu.concatenate %47, %0 in 1 : vector<8x32xf32>, vector<8x32xf32> -> vector<8x64xf32>
    %c184 = arith.constant 184 : index
    %c0_20 = arith.constant 0 : index
    %49 = vector.load %arg4[%c184, %c0_20] : memref<312x128xf32, #tpu.memory_space<vmem>>, vector<64x128xf32>
    %cst_21 = arith.constant dense<0.000000e+00> : vector<8x128xf32>
    %50 = tpu.matmul %48, %49, %cst_21 {dimension_numbers = #tpu.dot_dimension_numbers<[1], [0], [0], [1], [0, 0, 1, 1], [], []>} : vector<8x64xf32>, vector<64x128xf32>, vector<8x128xf32> -> vector<8x128xf32>
    %51 = vector.extract_strided_slice %3 {offsets = [4, 0], sizes = [1, 128], strides = [1, 1]} : vector<8x128xf32> to vector<1x128xf32>
    %52 = vector.broadcast %51 : vector<1x128xf32> to vector<8x128xf32>
    %53 = arith.addf %50, %52 : vector<8x128xf32>
    %54 = vector.extract_strided_slice %53 {offsets = [0, 0], sizes = [8, 32], strides = [1, 1]} : vector<8x128xf32> to vector<8x32xf32>
    %55 = arith.negf %54 : vector<8x32xf32>
    %56 = math.exp %55 : vector<8x32xf32>
    %cst_22 = arith.constant 1.000000e+00 : f32
    %57 = vector.broadcast %cst_22 : f32 to vector<8x32xf32>
    %58 = arith.addf %57, %56 : vector<8x32xf32>
    %59 = arith.divf %57, %58 : vector<8x32xf32>
    %60 = vector.extract_strided_slice %53 {offsets = [0, 32], sizes = [8, 32], strides = [1, 1]} : vector<8x128xf32> to vector<8x32xf32>
    %61 = arith.negf %60 : vector<8x32xf32>
    %62 = math.exp %61 : vector<8x32xf32>
    %cst_23 = arith.constant 1.000000e+00 : f32
    %63 = vector.broadcast %cst_23 : f32 to vector<8x32xf32>
    %64 = arith.addf %63, %62 : vector<8x32xf32>
    %65 = arith.divf %63, %64 : vector<8x32xf32>
    %66 = vector.extract_strided_slice %53 {offsets = [0, 64], sizes = [8, 32], strides = [1, 1]} : vector<8x128xf32> to vector<8x32xf32>
    %67 = math.tanh %66 : vector<8x32xf32>
    %68 = vector.extract_strided_slice %53 {offsets = [0, 96], sizes = [8, 32], strides = [1, 1]} : vector<8x128xf32> to vector<8x32xf32>
    %69 = arith.negf %68 : vector<8x32xf32>
    %70 = math.exp %69 : vector<8x32xf32>
    %cst_24 = arith.constant 1.000000e+00 : f32
    %71 = vector.broadcast %cst_24 : f32 to vector<8x32xf32>
    %72 = arith.addf %71, %70 : vector<8x32xf32>
    %73 = arith.divf %71, %72 : vector<8x32xf32>
    %74 = arith.mulf %65, %1 : vector<8x32xf32>
    %75 = arith.mulf %59, %67 : vector<8x32xf32>
    %76 = arith.addf %74, %75 : vector<8x32xf32>
    %77 = math.tanh %76 : vector<8x32xf32>
    %78 = arith.mulf %73, %77 : vector<8x32xf32>
    %79 = tpu.concatenate %78, %36 in 1 : vector<8x32xf32>, vector<8x32xf32> -> vector<8x64xf32>
    %c248 = arith.constant 248 : index
    %c0_25 = arith.constant 0 : index
    %80 = vector.load %arg4[%c248, %c0_25] : memref<312x128xf32, #tpu.memory_space<vmem>>, vector<64x32xf32>
    %cst_26 = arith.constant dense<0.000000e+00> : vector<8x32xf32>
    %81 = tpu.matmul %79, %80, %cst_26 {dimension_numbers = #tpu.dot_dimension_numbers<[1], [0], [0], [1], [0, 0, 1, 1], [], []>} : vector<8x64xf32>, vector<64x32xf32>, vector<8x32xf32> -> vector<8x32xf32>
    %82 = vector.extract_strided_slice %3 {offsets = [5, 0], sizes = [1, 32], strides = [1, 1]} : vector<8x128xf32> to vector<1x32xf32>
    %83 = vector.broadcast %82 : vector<1x32xf32> to vector<8x32xf32>
    %84 = arith.addf %81, %83 : vector<8x32xf32>
    %85 = arith.addf %41, %84 : vector<8x32xf32>
    %c0_27 = arith.constant 0 : index
    %c0_28 = arith.constant 0 : index
    %86 = vector.load %arg5[%c0_27, %c0_28] : memref<32x128xf32, #tpu.memory_space<vmem>>, vector<32x128xf32>
    %cst_29 = arith.constant dense<0.000000e+00> : vector<8x128xf32>
    %87 = tpu.matmul %85, %86, %cst_29 {dimension_numbers = #tpu.dot_dimension_numbers<[1], [0], [0], [1], [0, 0, 1, 1], [], []>} : vector<8x32xf32>, vector<32x128xf32>, vector<8x128xf32> -> vector<8x128xf32>
    %88 = vector.extract_strided_slice %87 {offsets = [0, 0], sizes = [8, 40], strides = [1, 1]} : vector<8x128xf32> to vector<8x40xf32>
    %89 = vector.extract_strided_slice %3 {offsets = [6, 0], sizes = [1, 40], strides = [1, 1]} : vector<8x128xf32> to vector<1x40xf32>
    %90 = vector.broadcast %89 : vector<1x40xf32> to vector<8x40xf32>
    %91 = arith.addf %88, %90 : vector<8x40xf32>
    %cst_30 = arith.constant dense<0xFF800000> : vector<8xf32>
    %92 = vector.multi_reduction <maximumf>, %91, %cst_30 [1] : vector<8x40xf32> to vector<8xf32>
    %93 = vector.shape_cast %92 : vector<8xf32> to vector<8x1xf32>
    %94 = vector.broadcast %93 : vector<8x1xf32> to vector<8x40xf32>
    %95 = arith.subf %91, %94 : vector<8x40xf32>
    %96 = math.exp %95 : vector<8x40xf32>
    %cst_31 = arith.constant dense<0.000000e+00> : vector<8xf32>
    %97 = vector.multi_reduction <add>, %96, %cst_31 [1] : vector<8x40xf32> to vector<8xf32>
    %98 = vector.shape_cast %97 : vector<8xf32> to vector<8x1xf32>
    %99 = math.log %98 : vector<8x1xf32>
    %100 = vector.broadcast %99 : vector<8x1xf32> to vector<8x40xf32>
    %101 = arith.subf %95, %100 : vector<8x40xf32>
    %cst_32 = arith.constant 0.000000e+00 : f32
    %102 = vector.broadcast %cst_32 : f32 to vector<8x256xf32>
    %c0_33 = arith.constant 0 : index
    %c0_34 = arith.constant 0 : index
    %103 = vector.load %arg7[%c0_33, %c0_34] : memref<8x256xf32, #tpu.memory_space<vmem>>, vector<8x256xf32>
    tpu.vector_store %arg7[%c0_33, %c0_34], %102 {strides = array<i32>} : memref<8x256xf32, #tpu.memory_space<vmem>>, vector<8x256xf32>,
    %c0_35 = arith.constant 0 : index
    %c0_36 = arith.constant 0 : index
    %104 = vector.load %arg7[%c0_35, %c0_36] : memref<8x256xf32, #tpu.memory_space<vmem>>, vector<8x40xf32>
    tpu.vector_store %arg7[%c0_35, %c0_36], %101 {strides = array<i32>} : memref<8x256xf32, #tpu.memory_space<vmem>>, vector<8x40xf32>,
    %c0_37 = arith.constant 0 : index
    %c128 = arith.constant 128 : index
    %105 = vector.load %arg7[%c0_37, %c128] : memref<8x256xf32, #tpu.memory_space<vmem>>, vector<8x32xf32>
    tpu.vector_store %arg7[%c0_37, %c128], %78 {strides = array<i32>} : memref<8x256xf32, #tpu.memory_space<vmem>>, vector<8x32xf32>,
    %c0_38 = arith.constant 0 : index
    %c160 = arith.constant 160 : index
    %106 = vector.load %arg7[%c0_38, %c160] : memref<8x256xf32, #tpu.memory_space<vmem>>, vector<8x32xf32>
    tpu.vector_store %arg7[%c0_38, %c160], %76 {strides = array<i32>} : memref<8x256xf32, #tpu.memory_space<vmem>>, vector<8x32xf32>,
    %c0_39 = arith.constant 0 : index
    %c192 = arith.constant 192 : index
    %107 = vector.load %arg7[%c0_39, %c192] : memref<8x256xf32, #tpu.memory_space<vmem>>, vector<8x16xf32>
    tpu.vector_store %arg7[%c0_39, %c192], %32 {strides = array<i32>} : memref<8x256xf32, #tpu.memory_space<vmem>>, vector<8x16xf32>,
    return
  }
}

</mosaic_0001>

<bundles_post_ra>
// kernel: tpu_custom_call.1
= control target key start
LH: loop header
LB: loop body
LE: loop exit
PB: predicated region body
PF: predicated region fallthrough
CT: control target
= control target key end

     0   :  { %12 = vsyncpa [#allocation3], 0  ;;  %s2854_s0 = inlined_call_operand.hbm [shape: f32[8,16,64], index: 0, kind: input, shape index: {}]   ;;  %s2855_s1 = inlined_call_operand.hbm [shape: f32[8,32], index: 1, kind: input, shape index: {}]   ;;  %s2856_s2 = inlined_call_operand.hbm [shape: f32[8,32], index: 2, kind: input, shape index: {}]   ;;  %s2857_s3 = inlined_call_operand.hbm [shape: f32[8,24], index: 3, kind: input, shape index: {}]   ;;  %s2858_s4 = inlined_call_operand.hbm [shape: f32[312,128], index: 4, kind: input, shape index: {}]   ;;  %s2859_s5 = inlined_call_operand.hbm [shape: f32[32,128], index: 5, kind: input, shape index: {}]   ;;  %s2860_s6 = inlined_call_operand.vmem [shape: f32[8,128], index: 6, kind: input, shape index: {}]   ;;  %s2861_s7 = inlined_call_operand.hbm [shape: f32[8,256], index: 7, kind: output, shape index: {}]  }
   0x1   :  { %13 = vsyncpa [#allocation6], 0 }
   0x2   :  { %14 = vsyncpa [#allocation9], 0 }
   0x3   :  { %15 = vsyncpa [#allocation12], 0 }
   0x4   :  { %16 = vsyncpa [#allocation4], 0  ;;  %s2206_s24 = smov [#allocation5]   ;;  %s2207_s26 = smov [#allocation8]  }
   0x5   :  { %s35_s25 = sshll.u32 %s2206_s24, 4  ;;  %s55_s27 = sshll.u32 %s2207_s26, 4  ;;  %s36_s25 = int_to_ptr.vmem [resolvable:$true] %s35_s25  ;;  %s56_s27 = int_to_ptr.vmem [resolvable:$true] %s55_s27 }
   0x6   :  { %s2064_s28 = scalar_lea.vmem %s36_s25, 128  ;;  %p2069_p1 = scmp.lt.s32.totalorder %s36_s25, %s36_s25 }
   0x7   :  { %p2065_p0 = scmp.ne.s32.totalorder %s36_s25, %s2064_s28  ;;  %p2070_p2 = scmp.lt.s32.totalorder %s2064_s28, %s2064_s28 }
   0x9   :  { %p2071_p3 = por %p2070_p2, %p2069_p1 }
   0xb   :  { %p2072_p4 = pnand %p2071_p3, %p2065_p0 }
   0xd   :  { %2075 = shalt.err (!%p2072_p4)
}
   0xe   :  { %38 = dma.hbm_to_vmem [thread:$0]  %s2855_s1, 128, %s36_s25, [#allocation6]  }
   0xf   :  { %s2084_s8 = scalar_lea.vmem %s56_s27, 128  ;;  %p2089_p6 = scmp.lt.s32.totalorder %s56_s27, %s56_s27 }
  0x10   :  { %p2085_p5 = scmp.ne.s32.totalorder %s56_s27, %s2084_s8  ;;  %p2090_p7 = scmp.lt.s32.totalorder %s2084_s8, %s2084_s8 }
  0x12   :  { %p2091_p8 = por %p2090_p7, %p2089_p6 }
  0x14   :  { %p2092_p9 = pnand %p2091_p8, %p2085_p5 }
  0x16   :  { %2095 = shalt.err (!%p2092_p9)
}
  0x17   :  { %58 = dma.hbm_to_vmem [thread:$0]  %s2857_s3, 128, %s56_s27, [#allocation9]  }
  0x18   :  { %s2208_s11 = smov [#allocation2]  }
  0x19   :  { %s22_s12 = sshll.u32 %s2208_s11, 4  ;;  %s23_s12 = int_to_ptr.vmem [resolvable:$true] %s22_s12 }
  0x1a   :  { %s2104_s13 = scalar_lea.vmem %s23_s12, 2048  ;;  %p2109_p11 = scmp.lt.s32.totalorder %s23_s12, %s23_s12 }
  0x1b   :  { %p2105_p10 = scmp.ne.s32.totalorder %s23_s12, %s2104_s13  ;;  %p2110_p12 = scmp.lt.s32.totalorder %s2104_s13, %s2104_s13 }
  0x1d   :  { %p2111_p13 = por %p2110_p12, %p2109_p11 }
  0x1f   :  { %p2112_p0 = pnand %p2111_p13, %p2105_p10 }
  0x21   :  { %2115 = shalt.err (!%p2112_p0)
}
  0x22   :  { %s2209_s1 = smov 128   ;;  %s2210_s14 = smov 8  }
  0x23   :  { %28 = dma.hbm_to_vmem [thread:$0]  %s2854_s0, 2048, %s23_s12, [#allocation3], %s2209_s1, %s2209_s1, %s2210_s14  }
  0x24   :  { %s2211_s3 = smov [#allocation7]   ;;  %s2212_s18 = smov [#allocation10]  }
  0x25   :  { %s45_s17 = sshll.u32 %s2211_s3, 4  ;;  %s64_s19 = sshll.u32 %s2212_s18, 4  ;;  %s46_s17 = int_to_ptr.vmem [resolvable:$true] %s45_s17  ;;  %s65_s19 = int_to_ptr.vmem [resolvable:$true] %s64_s19 }
  0x26   :  { %s2124_s20 = scalar_lea.vmem %s46_s17, 128  ;;  %p2129_p2 = scmp.lt.s32.totalorder %s46_s17, %s46_s17 }
  0x27   :  { %p2125_p1 = scmp.ne.s32.totalorder %s46_s17, %s2124_s20  ;;  %p2130_p3 = scmp.lt.s32.totalorder %s2124_s20, %s2124_s20 }
  0x29   :  { %p2131_p4 = por %p2130_p3, %p2129_p2 }
  0x2b   :  { %p2132_p5 = pnand %p2131_p4, %p2125_p1 }
  0x2d   :  { %2135 = shalt.err (!%p2132_p5)
}
  0x2e   :  { %48 = dma.hbm_to_vmem [thread:$0]  %s2856_s2, 128, %s46_s17, [#allocation6]  }
  0x2f   :  { %s2144_s23 = scalar_lea.vmem %s65_s19, 4992  ;;  %p2149_p7 = scmp.lt.s32.totalorder %s65_s19, %s65_s19 }
  0x30   :  { %p2145_p6 = scmp.ne.s32.totalorder %s65_s19, %s2144_s23  ;;  %p2150_p8 = scmp.lt.s32.totalorder %s2144_s23, %s2144_s23 }
  0x32   :  { %p2151_p9 = por %p2150_p8, %p2149_p7 }
  0x34   :  { %p2152_p10 = pnand %p2151_p9, %p2145_p6 }
  0x36   :  { %2155 = shalt.err (!%p2152_p10)
}
  0x37   :  { %70 = dma.hbm_to_vmem [thread:$0]  %s2858_s4, 4992, %s65_s19, [#allocation9], %s2209_s1, %s2209_s1, %s2210_s14  }
  0x38   :  { %s2213_s25 = smov [#allocation11]  }
  0x39   :  { %s76_s26 = sshll.u32 %s2213_s25, 4  ;;  %s77_s26 = int_to_ptr.vmem [resolvable:$true] %s76_s26 }
  0x3a   :  { %s2164_s27 = scalar_lea.vmem %s77_s26, 512  ;;  %p2169_p12 = scmp.lt.s32.totalorder %s77_s26, %s77_s26 }
  0x3b   :  { %p2165_p11 = scmp.ne.s32.totalorder %s77_s26, %s2164_s27  ;;  %p2170_p13 = scmp.lt.s32.totalorder %s2164_s27, %s2164_s27 }
  0x3d   :  { %p2171_p0 = por %p2170_p13, %p2169_p12 }
  0x3f   :  { %p2172_p1 = pnand %p2171_p0, %p2165_p11 }
  0x41   :  { %2175 = shalt.err (!%p2172_p1)
}
  0x42   :  { %82 = dma.hbm_to_vmem [thread:$0]  %s2859_s5, 512, %s77_s26, [#allocation12], %s2209_s1, %s2209_s1, %s2210_s14  }
  0x43   :  { %2196 = dma.done.wait [#allocation3], 2048  }
  0x44   :  { %2197 = vsyncadd [#allocation3], 4294965248 }
  0x45   :  { %2198 = dma.done.wait [#allocation6], 256  }
  0x46   :  { %2199 = vsyncadd [#allocation6], 4294967040 }
  0x47   :  { %2200 = dma.done.wait [#allocation9], 5120  }
  0x48   :  { %2201 = vsyncadd [#allocation9], 4294962176 }
  0x49   :  { %2202 = dma.done.wait [#allocation12], 512  }
  0x4a   :  { %2203 = vsyncadd [#allocation12], 4294966784  ;;  %v130_v0 = vld [vmem:[#allocation10 + $0x38] sm:$0xff]  ;;  %v129_v1 = vld [vmem:[#allocation10 + $0x30] sm:$0xff]  ;;  %vm135_vm0 = vcmask 523264   ;;  %v131_v26 = vlaneseq  ;;  %vm471_vm1 = vcmask 261120  }
  0x4b   :  { %1818 = vmatprep.subr.mxu0 %v130_v0  ;;  %v128_v2 = vld [vmem:[#allocation10 + $0x28] sm:$0xff]  ;;  %v127_v4 = vld [vmem:[#allocation10 + $0x20] sm:$0xff]  ;;  %v126_v5 = vld [vmem:[#allocation10 + $0x18] sm:$0xff]  ;;  %v2214_v27 = vmov 1966171168   ;;  %vm568_vm2 = vcmask 130112  }
  0x4c   :  { %1819 = vmatpush3.msra.mxu0 %v130_v0  ;;  %v107_v3 = vld [vmem:[#allocation2] sm:$0xff]  ;;  %v125_v6 = vld [vmem:[#allocation10 + $0x10] sm:$0xff]  ;;  %v123_v8 = vld [vmem:[#allocation10] sm:$0xff]  ;;  %v332_v28 = vunpack.c.l.s4 %v2214_v27  ;;  %v2311_v29 = vshrl.u32 %v131_v26, 7  ;;  %vm633_vm3 = vcmask 1041409   ;;  %vm635_vm4 = vcmask 1042434  }
  0x4d   :  { %1820 = vmatprep.subr.mxu0 %v129_v1  ;;  %1834 = vmatprep.mubr.msk.f32.mxu0 %vm135_vm0, %v107_v3  ;;  %v124_v7 = vld [vmem:[#allocation10 + $0x8] sm:$0xff]  ;;  %v108_v9 = vld [vmem:[#allocation2 + $0x8] sm:$0xff]  ;;  %v109_v10 = vld [vmem:[#allocation2 + $0x10] sm:$0xff]  ;;  %vm637_vm5 = vcmask 1043459   ;;  %vm639_vm6 = vcmask 1044484   ;;  %vm641_vm7 = vcmask 1045509  }
  0x4e   :  { %1821 = vmatpush3.msra.mxu0 %v129_v1  ;;  %v110_v11 = vld [vmem:[#allocation2 + $0x18] sm:$0xff]  ;;  %v111_v12 = vld [vmem:[#allocation2 + $0x20] sm:$0xff]  ;;  %v112_v13 = vld [vmem:[#allocation2 + $0x28] sm:$0xff]  ;;  %v333_v30 = vunpack.c.0.s8 %v332_v28  ;;  %v2318_v34 = vsub.s32 0, %v2311_v29  ;;  %v2350_v63 = vsub.s32 7, %v2311_v29  ;;  %vm643_vm8 = vcmask 1046534  }
  0x4f   :  { %1822 = vmatprep.subr.mxu0 %v128_v2  ;;  %v113_v14 = vld [vmem:[#allocation2 + $0x30] sm:$0xff]  ;;  %v114_v15 = vld [vmem:[#allocation2 + $0x38] sm:$0xff]  ;;  %v115_v16 = vld [vmem:[#allocation2 + $0x40] sm:$0xff]  ;;  %vm645_vm9 = vcmask 1047559   ;;  %vm648_vm10 = vcmask 130048   ;;  %vm2217_vm11 = vmmov 0  }
  0x50   :  { %1823 = vmatpush3.msra.mxu0 %v128_v2  ;;  %v116_v17 = vld [vmem:[#allocation2 + $0x48] sm:$0xff]  ;;  %v117_v18 = vld [vmem:[#allocation2 + $0x50] sm:$0xff]  ;;  %v118_v19 = vld [vmem:[#allocation2 + $0x58] sm:$0xff]  ;;  %v336_v31 = vsub.s32 %v333_v30, %v2311_v29  ;;  %vm1128_vm12 = vcmask 195584   ;;  %s2218_s30 = smov 32   ;;  %s2219_s8 = smov 64  }
  0x51   :  { %1824 = vmatprep.subr.mxu0 %v127_v4  ;;  %v119_v20 = vld [vmem:[#allocation2 + $0x60] sm:$0xff]  ;;  %v120_v21 = vld [vmem:[#allocation2 + $0x68] sm:$0xff]  ;;  %v121_v22 = vld [vmem:[#allocation2 + $0x70] sm:$0xff]  ;;  %vm1639_vm13 = vcmask 654912   ;;  %vm1243_vm14 = vcmask 785408   ;;  %vm1627_vm15 = vcmask 523520  }
  0x52   :  { %1825 = vmatpush3.msra.mxu0 %v127_v4  ;;  %v122_v23 = vld [vmem:[#allocation2 + $0x78] sm:$0xff]  ;;  %v2307_v24 = vld [vmem:[%s2860_s6] sm:$0xff] }
  0x53   :  { %1826 = vmatprep.subr.mxu0 %v126_v5  ;;  %v521_v25 = vrot.slane %v2307_v24, 1  ;;  %v2314_v32 = vld [vmem:[#allocation5] sm:$0xff]  ;;  %v2322_v37 = vrot.slane %v2307_v24, %v2318_v34 }
  0x54   :  { %1827 = vmatpush3.msra.mxu0 %v126_v5  ;;  %v337_v33 = vrot.slane %v2314_v32, %v336_v31  ;;  %v330_v47 = vcombine.high %v2314_v32, %v2314_v32 }
  0x55   :  { %1828 = vmatprep.subr.mxu0 %v125_v6  ;;  %1943 = vpush %v521_v25 }
  0x56   :  { %1829 = vmatpush3.msra.mxu0 %v125_v6  ;;  %v353_v35 = vrot.slane %v337_v33, %v336_v31  ;;  %v345_v36 = vcombine.high %v337_v33, %v337_v33  ;;  %v344_v56 = vrot.slane %v330_v47, %v336_v31 }
  0x57   :  { %1830 = vmatprep.subr.mxu0 %v124_v7 }
  0x58   :  { %1831 = vmatpush3.msra.mxu0 %v124_v7  ;;  %v382_v38 = vrot.slane %v353_v35, %v2318_v34  ;;  %v367_v39 = vrot.slane %v345_v36, %v336_v31  ;;  %v375_v43 = vcombine.high %v353_v35, %v353_v35  ;;  %v346_v62 = vcombine.high %v344_v56, %v344_v56 }
  0x59   :  { %1832 = vmatprep.subr.mxu0 %v123_v8  ;;  %v360_v2 = vrot.slane %v344_v56, %v336_v31 }
  0x5a   :  { %1833 = vmatpush3.msra.mxu0 %v123_v8  ;;  %v386_v46 = vrot.slane %v367_v39, %v2318_v34  ;;  %v390_v52 = vrot.slane %v375_v43, %v2318_v34  ;;  %v377_v53 = vcombine.high %v367_v39, %v367_v39  ;;  %v374_v7 = vrot.slane %v346_v62, %v336_v31 }
  0x5b   :  { %1835 = vmatmul.mubr.msk.f32.vlgmr.msra.gmra.mxu0 %vm135_vm0, %v108_v9  ;;  %v2362_v8 = vrot.slane %v2307_v24, %v2350_v63 }
  0x5c   :  { %1837 = vmatprep.mubr.msk.f32.mxu0 %vm135_vm0, %v109_v10  ;;  %v394_v61 = vrot.slane %v377_v53, %v2318_v34  ;;  %v378_v36 = vcombine.high %v374_v7, %v374_v7 }
  0x5e   :  { %v410_v56 = vrot.slane %v378_v36, %v2318_v34 }
  0x5f   :  { %1838 = vmatmul.mubr.msk.f32.gmra.mxu0 %vm135_vm0, %v110_v11  ;;  %v398_v11 = vrot.slane %v360_v2, %v2318_v34 }
  0x60   :  { %1840 = vmatprep.mubr.msk.f32.mxu0 %vm135_vm0, %v111_v12 }
  0x63   :  { %1841 = vmatmul.mubr.msk.f32.gmra.mxu0 %vm135_vm0, %v112_v13 }
  0x64   :  { %1843 = vmatprep.mubr.msk.f32.mxu0 %vm135_vm0, %v113_v14 }
  0x67   :  { %1844 = vmatmul.mubr.msk.f32.gmra.mxu0 %vm135_vm0, %v114_v15 }
  0x68   :  { %1846 = vmatprep.mubr.msk.f32.mxu0 %vm135_vm0, %v115_v16 }
  0x6b   :  { %1847 = vmatmul.mubr.msk.f32.gmra.mxu0 %vm135_vm0, %v116_v17  ;;  %v402_v17 = vrot.slane %v374_v7, %v2318_v34 }
  0x6c   :  { %1849 = vmatprep.mubr.msk.f32.mxu0 %vm135_vm0, %v117_v18  ;;  %v376_v18 = vcombine.high %v360_v2, %v360_v2 }
  0x6e   :  { %v406_v33 = vrot.slane %v376_v18, %v2318_v34 }
  0x6f   :  { %1850 = vmatmul.mubr.msk.f32.gmra.mxu0 %vm135_vm0, %v118_v19 }
  0x70   :  { %1852 = vmatprep.mubr.msk.f32.mxu0 %vm135_vm0, %v119_v20 }
  0x73   :  { %1853 = vmatmul.mubr.msk.f32.gmra.mxu0 %vm135_vm0, %v120_v21 }
  0x74   :  { %1855 = vmatprep.mubr.msk.f32.mxu0 %vm135_vm0, %v121_v22 }
  0x77   :  { %1856 = vmatmul.mubr.msk.f32.gmra.mxu0 %vm135_vm0, %v122_v23 }
  0x86   :  { %s1944_s29 = spop %1943 }
 0x11b   :  { %v1836_v40 = vpop.f32.mrf.mxu0 }
 0x11c   :  { %v2326_v41 = vadd.f32 %v1836_v40, %v2322_v37 }
 0x11d   :  { %v250_v42 = vpop.f32.mrf.mxu0 }
 0x11e   :  { %v420_v44 = vadd.f32 %v382_v38, %v2326_v41  ;;  %v2330_v45 = vadd.f32 %v250_v42, %v2322_v37 }
 0x11f   :  { %v1839_v48 = vpop.f32.mrf.mxu0 }
 0x120   :  { %1963 = vtanh.f32 %v420_v44  ;;  %v419_v49 = vadd.f32 %v382_v38, %v2330_v45  ;;  %v2337_v50 = vadd.f32 %v1839_v48, %v2322_v37 }
 0x121   :  { %v260_v51 = vpop.f32.mrf.mxu0 }
 0x122   :  { %1965 = vtanh.f32 %v419_v49  ;;  %v422_v54 = vadd.f32 %v386_v46, %v2337_v50  ;;  %v2342_v55 = vadd.f32 %v260_v51, %v2322_v37 }
 0x123   :  { %v1842_v57 = vpop.f32.mrf.mxu0 }
 0x124   :  { %1967 = vtanh.f32 %v422_v54  ;;  %v421_v58 = vadd.f32 %v386_v46, %v2342_v55  ;;  %v2346_v59 = vadd.f32 %v1842_v57, %v2322_v37 }
 0x125   :  { %v270_v60 = vpop.f32.mrf.mxu0 }
 0x126   :  { %1969 = vtanh.f32 %v421_v58  ;;  %v424_v0 = vadd.f32 %v390_v52, %v2346_v59  ;;  %v2354_v1 = vadd.f32 %v270_v60, %v2322_v37 }
 0x127   :  { %v1845_v3 = vpop.f32.mrf.mxu0 }
 0x128   :  { %1971 = vtanh.f32 %v424_v0  ;;  %v423_v4 = vadd.f32 %v390_v52, %v2354_v1  ;;  %v2358_v5 = vadd.f32 %v1845_v3, %v2322_v37 }
 0x129   :  { %v280_v6 = vpop.f32.mrf.mxu0 }
 0x12a   :  { %1973 = vtanh.f32 %v423_v4  ;;  %v426_v9 = vadd.f32 %v394_v61, %v2358_v5  ;;  %v2366_v10 = vadd.f32 %v280_v6, %v2322_v37 }
 0x12b   :  { %v1848_v12 = vpop.f32.mrf.mxu0 }
 0x12c   :  { %1975 = vtanh.f32 %v426_v9  ;;  %v425_v13 = vadd.f32 %v394_v61, %v2366_v10  ;;  %v2371_v14 = vadd.f32 %v1848_v12, %v2322_v37 }
 0x12d   :  { %v1964_v15 = vpop.eup %1963  ;;  %v290_v16 = vpop.f32.mrf.mxu0 }
 0x12e   :  { %1977 = vtanh.f32 %v425_v13  ;;  %v428_v19 = vadd.f32 %v398_v11, %v2371_v14  ;;  %v2376_v20 = vadd.f32 %v290_v16, %v2322_v37  ;;  %v456_v21 = vmul.f32 %v1964_v15, %v2362_v8 }
 0x12f   :  { %v1966_v22 = vpop.eup %1965  ;;  %v1851_v23 = vpop.f32.mrf.mxu0 }
 0x130   :  { %1979 = vtanh.f32 %v428_v19  ;;  %v427_v25 = vadd.f32 %v398_v11, %v2376_v20  ;;  %v2381_v27 = vadd.f32 %v1851_v23, %v2322_v37  ;;  %v475_v28 = vsel %vm471_vm1, %v456_v21, 0.0 }
 0x131   :  { %v1968_v30 = vpop.eup %1967  ;;  %v300_v31 = vpop.f32.mrf.mxu0  ;;  %476 = vadd.xlane.f32.xlu0 %v475_v28  ;;  %v455_v35 = vmul.f32 %v1966_v22, %v2362_v8 }
 0x132   :  { %2870 = vst [vmem:[#allocation19_spill] sm:$0xff] %v2381_v27  ;;  %1981 = vtanh.f32 %v427_v25  ;;  %v430_v38 = vadd.f32 %v402_v17, %v2381_v27  ;;  %v2388_v39 = vadd.f32 %v300_v31, %v2322_v37  ;;  %v458_v40 = vmul.f32 %v1968_v30, %v2362_v8 }
 0x133   :  { %v1970_v42 = vpop.eup %1969  ;;  %v1854_v43 = vpop.f32.mrf.mxu0  ;;  %v472_v44 = vsel %vm471_vm1, %v455_v35, 0.0 }
 0x134   :  { %1983 = vtanh.f32 %v430_v38  ;;  %v429_v46 = vadd.f32 %v402_v17, %v2388_v39  ;;  %v2394_v47 = vadd.f32 %v1854_v43, %v2322_v37  ;;  %v481_v48 = vsel %vm471_vm1, %v458_v40, 0.0 }
 0x135   :  { %v1972_v49 = vpop.eup %1971  ;;  %v310_v51 = vpop.f32.mrf.mxu0  ;;  %473 = vadd.xlane.f32.xlu0 %v472_v44  ;;  %482 = vadd.xlane.f32.xlu1 %v481_v48  ;;  %v457_v52 = vmul.f32 %v1970_v42, %v2362_v8 }
 0x136   :  { %2871 = vst [vmem:[#allocation20_spill] sm:$0xff] %v2394_v47  ;;  %1985 = vtanh.f32 %v429_v46  ;;  %v432_v53 = vadd.f32 %v406_v33, %v2394_v47  ;;  %v2400_v54 = vadd.f32 %v310_v51, %v2322_v37  ;;  %v460_v61 = vmul.f32 %v1972_v49, %v2362_v8 }
 0x137   :  { %v1974_v57 = vpop.eup %1973  ;;  %v1857_v58 = vpop.f32.mrf.mxu0  ;;  %v478_v60 = vsel %vm471_vm1, %v457_v52, 0.0 }
 0x138   :  { %2872 = vst [vmem:[#allocation21_spill] sm:$0xff] %v2400_v54  ;;  %1987 = vtanh.f32 %v432_v53  ;;  %v431_v62 = vadd.f32 %v406_v33, %v2400_v54  ;;  %v2407_v0 = vadd.f32 %v1857_v58, %v2322_v37  ;;  %v459_v2 = vmul.f32 %v1974_v57, %v2362_v8 }
 0x139   :  { %v1976_v3 = vpop.eup %1975  ;;  %v320_v4 = vpop.f32.mrf.mxu0  ;;  %479 = vadd.xlane.f32.xlu1 %v478_v60  ;;  %v487_v12 = vsel %vm471_vm1, %v460_v61, 0.0 }
 0x13a   :  { %2873 = vst [vmem:[#allocation22_spill] sm:$0xff] %v2407_v0  ;;  %1989 = vtanh.f32 %v431_v62  ;;  %v434_v6 = vadd.f32 %v410_v56, %v2407_v0  ;;  %v2412_v7 = vadd.f32 %v320_v4, %v2322_v37  ;;  %v484_v9 = vsel %vm471_vm1, %v459_v2, 0.0 }
 0x13b   :  { %v1978_v11 = vpop.eup %1977  ;;  %485 = vadd.xlane.f32.xlu0 %v484_v9  ;;  %v462_v16 = vmul.f32 %v1976_v3, %v2362_v8  ;;  %v2438_v4 = vand.u32 127, %v131_v26  ;;  %v523_v9 = vstv %s1944_s29 }
 0x13c   :  { %2874 = vst [vmem:[#allocation23_spill] sm:$0xff] %v2412_v7  ;;  %1991 = vtanh.f32 %v434_v6  ;;  %v433_v13 = vadd.f32 %v410_v56, %v2412_v7  ;;  %v461_v15 = vmul.f32 %v1978_v11, %v2362_v8 }
 0x13d   :  { %v1980_v17 = vpop.eup %1979  ;;  %488 = vadd.xlane.f32.xlu1 %v487_v12  ;;  %v493_v19 = vsel %vm471_vm1, %v462_v16, 0.0  ;;  %v563_v11 = vadd.s32 4294967288, %v2438_v4 }
 0x13e   :  { %1993 = vtanh.f32 %v433_v13  ;;  %v490_v18 = vsel %vm471_vm1, %v461_v15, 0.0  ;;  %v464_v22 = vmul.f32 %v1980_v17, %v2362_v8  ;;  %v2445_v15 = vsub.s32 %v2438_v4, %v2311_v29 }
 0x13f   :  { %v1982_v37 = vpop.eup %1981  ;;  %491 = vadd.xlane.f32.xlu0 %v490_v18 }
 0x140   :  { %v463_v21 = vmul.f32 %v1982_v37, %v2362_v8  ;;  %v499_v30 = vsel %vm471_vm1, %v464_v22, 0.0 }
 0x141   :  { %v1984_v23 = vpop.eup %1983  ;;  %494 = vadd.xlane.f32.xlu1 %v493_v19  ;;  %v2456_v19 = vsub.s32 %v563_v11, %v2311_v29 }
 0x142   :  { %v496_v25 = vsel %vm471_vm1, %v463_v21, 0.0  ;;  %v466_v33 = vmul.f32 %v1984_v23, %v2362_v8 }
 0x143   :  { %v1986_v28 = vpop.eup %1985  ;;  %497 = vadd.xlane.f32.xlu0 %v496_v25 }
 0x144   :  { %v465_v31 = vmul.f32 %v1986_v28, %v2362_v8  ;;  %v505_v40 = vsel %vm471_vm1, %v466_v33, 0.0 }
 0x145   :  { %v1988_v35 = vpop.eup %1987  ;;  %500 = vadd.xlane.f32.xlu1 %v499_v30 }
 0x146   :  { %v502_v36 = vsel %vm471_vm1, %v465_v31, 0.0  ;;  %v468_v43 = vmul.f32 %v1988_v35, %v2362_v8 }
 0x147   :  { %v1990_v38 = vpop.eup %1989  ;;  %503 = vadd.xlane.f32.xlu0 %v502_v36 }
 0x148   :  { %v467_v42 = vmul.f32 %v1990_v38, %v2362_v8  ;;  %v511_v49 = vsel %vm471_vm1, %v468_v43, 0.0 }
 0x149   :  { %v1992_v44 = vpop.eup %1991  ;;  %506 = vadd.xlane.f32.xlu1 %v505_v40 }
 0x14a   :  { %v508_v46 = vsel %vm471_vm1, %v467_v42, 0.0  ;;  %v470_v52 = vmul.f32 %v1992_v44, %v2362_v8 }
 0x14b   :  { %v1994_v48 = vpop.eup %1993  ;;  %509 = vadd.xlane.f32.xlu0 %v508_v46 }
 0x14c   :  { %v469_v51 = vmul.f32 %v1994_v48, %v2362_v8  ;;  %v517_v56 = vsel %vm471_vm1, %v470_v52, 0.0 }
 0x14d   :  { %512 = vadd.xlane.f32.xlu1 %v511_v49 }
 0x14e   :  { %v514_v53 = vsel %vm471_vm1, %v469_v51, 0.0 }
 0x14f   :  { %515 = vadd.xlane.f32.xlu0 %v514_v53 }
 0x151   :  { %518 = vadd.xlane.f32.xlu1 %v517_v56 }
 0x1ba   :  { %v477_v57 = vpop.xlane.xlu0 %476 }
 0x1bb   :  { %v2458_v21 = vadd.f32 %v523_v9, %v477_v57 }
 0x1bd   :  { %v567_v44 = vrot.slane %v2458_v21, %v2456_v19 }
 0x1be   :  { %v483_v58 = vpop.xlane.xlu1 %482  ;;  %v474_v60 = vpop.xlane.xlu0 %473 }
 0x1bf   :  { %v2447_v16 = vadd.f32 %v523_v9, %v474_v60  ;;  %v2451_v26 = vadd.f32 %v523_v9, %v483_v58 }
 0x1c1   :  { %v562_v33 = vrot.slane %v2447_v16, %v2445_v15  ;;  %v577_v40 = vrot.slane %v2451_v26, %v2456_v19 }
 0x1c2   :  { %v480_v61 = vpop.xlane.xlu1 %479 }
 0x1c3   :  { %v2441_v13 = vadd.f32 %v523_v9, %v480_v61  ;;  %v569_v58 = vsel %vm568_vm2, %v567_v44, %v562_v33 }
 0x1c4   :  { %v486_v62 = vpop.xlane.xlu0 %485 }
 0x1c5   :  { %v2460_v22 = vadd.f32 %v523_v9, %v486_v62  ;;  %v573_v28 = vrot.slane %v2441_v13, %v2445_v15 }
 0x1c6   :  { %v489_v2 = vpop.xlane.xlu1 %488 }
 0x1c7   :  { %v2449_v17 = vadd.f32 %v523_v9, %v489_v2  ;;  %v582_v46 = vrot.slane %v2460_v22, %v2445_v15  ;;  %v578_v52 = vsel %vm568_vm2, %v577_v40, %v573_v28 }
 0x1c8   :  { %v492_v3 = vpop.xlane.xlu0 %491  ;;  %v634_v11 = vsel %vm633_vm3, %v578_v52, %v569_v58  ;;  %v2864_v58 = vsub.s32 1, %v2311_v29 }
 0x1c9   :  { %v2466_v30 = vadd.f32 %v523_v9, %v492_v3  ;;  %v586_v35 = vrot.slane %v2449_v17, %v2456_v19 }
 0x1ca   :  { %v495_v6 = vpop.xlane.xlu1 %494 }
 0x1cb   :  { %v2453_v37 = vadd.f32 %v523_v9, %v495_v6  ;;  %v591_v53 = vrot.slane %v2466_v30, %v2445_v15  ;;  %v587_v60 = vsel %vm568_vm2, %v586_v35, %v582_v46 }
 0x1cc   :  { %v498_v8 = vpop.xlane.xlu0 %497  ;;  %v636_v28 = vsel %vm635_vm4, %v587_v60, %v634_v11  ;;  %v2538_v11 = vsub.s32 2, %v2311_v29 }
 0x1cd   :  { %v2474_v36 = vadd.f32 %v523_v9, %v498_v8  ;;  %v595_v42 = vrot.slane %v2453_v37, %v2456_v19 }
 0x1ce   :  { %v501_v12 = vpop.xlane.xlu1 %500 }
 0x1cf   :  { %v2462_v23 = vadd.f32 %v523_v9, %v501_v12  ;;  %v600_v61 = vrot.slane %v2474_v36, %v2445_v15  ;;  %v596_v2 = vsel %vm568_vm2, %v595_v42, %v591_v53 }
 0x1d0   :  { %v504_v18 = vpop.xlane.xlu0 %503 }
 0x1d1   :  { %v2480_v43 = vadd.f32 %v523_v9, %v504_v18  ;;  %v604_v48 = vrot.slane %v2462_v23, %v2456_v19 }
 0x1d2   :  { %v507_v25 = vpop.xlane.xlu1 %506 }
 0x1d3   :  { %v2468_v31 = vadd.f32 %v523_v9, %v507_v25  ;;  %v609_v3 = vrot.slane %v2480_v43, %v2445_v15  ;;  %v605_v12 = vsel %vm568_vm2, %v604_v48, %v600_v61 }
 0x1d4   :  { %v510_v38 = vpop.xlane.xlu0 %509 }
 0x1d5   :  { %v2488_v49 = vadd.f32 %v523_v9, %v510_v38  ;;  %v613_v56 = vrot.slane %v2468_v31, %v2456_v19  ;;  %v638_v38 = vsel %vm637_vm5, %v596_v2, %v636_v28  ;;  %v2533_v2 = vsub.s32 5, %v2311_v29 }
 0x1d6   :  { %v513_v51 = vpop.xlane.xlu1 %512  ;;  %v640_v46 = vsel %vm639_vm6, %v605_v12, %v638_v38 }
 0x1d7   :  { %v2495_v57 = vadd.f32 %v523_v9, %v513_v51  ;;  %v618_v18 = vrot.slane %v2488_v49, %v2445_v15  ;;  %v614_v33 = vsel %vm568_vm2, %v613_v56, %v609_v3  ;;  %v2215_v56 = vmov 0  }
 0x1d8   :  { %v516_v62 = vpop.xlane.xlu0 %515  ;;  %v642_v48 = vsel %vm641_vm7, %v614_v33, %v640_v46  ;;  %1961 = vset.pattern.permute.xlu0 %v2215_v56  ;;  %1960 = vset.pattern.permute.xlu1 %v2215_v56 }
 0x1d9   :  { %v622_v6 = vrot.slane %v2495_v57, %v2456_v19  ;;  %v2506_v8 = vadd.f32 %v523_v9, %v516_v62 }
 0x1da   :  { %v519_v25 = vpop.xlane.xlu1 %518 }
 0x1db   :  { %v2514_v35 = vadd.f32 %v523_v9, %v519_v25  ;;  %v623_v40 = vsel %vm568_vm2, %v622_v6, %v618_v18  ;;  %v627_v42 = vrot.slane %v2506_v8, %v2445_v15  ;;  %v2542_v18 = vsub.s32 6, %v2311_v29 }
 0x1dc   :  { %v644_v51 = vsel %vm643_vm8, %v623_v40, %v642_v48 }
 0x1dd   :  { %v631_v44 = vrot.slane %v2514_v35, %v2456_v19 }
 0x1df   :  { %v632_v9 = vsel %vm568_vm2, %v631_v44, %v627_v42  ;;  %v2553_v42 = vsub.s32 3, %v2311_v29 }
 0x1e0   :  { %v646_v52 = vsel %vm645_vm9, %v632_v9, %v644_v51 }
 0x1e1   :  { %v649_v53 = vsel %vm648_vm10, %v646_v52, -inf }
 0x1e2   :  { %650 = vmax.xlane.f32.xlu0 %v649_v53 }
 0x26b   :  { %v651_v60 = vpop.xlane.xlu0 %650 }
 0x26c   :  { %v656_v61 = vrot.slane %v651_v60, %v2318_v34  ;;  %v660_v62 = vrot.slane %v651_v60, %v2864_v58  ;;  %v2545_v25 = vrot.slane %v651_v60, %v2533_v2  ;;  %v664_v38 = vrot.slane %v651_v60, %v2538_v11 }
 0x26d   :  { %v684_v48 = vrot.slane %v651_v60, %v2350_v63  ;;  %v668_v51 = vrot.slane %v651_v60, %v2553_v42 }
 0x26e   :  { %v693_v3 = vsub.f32 %v2447_v16, %v656_v61  ;;  %v694_v6 = vsub.f32 %v2458_v21, %v656_v61  ;;  %v695_v12 = vsub.f32 %v2441_v13, %v660_v62  ;;  %v696_v40 = vsub.f32 %v2451_v26, %v660_v62 }
 0x26f   :  { %v680_v21 = vrot.slane %v651_v60, %v2542_v18  ;;  %v703_v13 = vsub.f32 %v2480_v43, %v2545_v25  ;;  %v697_v44 = vsub.f32 %v2460_v22, %v664_v38  ;;  %v698_v52 = vsub.f32 %v2449_v17, %v664_v38 }
 0x270   :  { %v709_v28 = vmul.f32 1.442695, %v693_v3  ;;  %v711_v33 = vmul.f32 1.442695, %v694_v6  ;;  %v713_v16 = vmul.f32 1.442695, %v695_v12  ;;  %v707_v43 = vsub.f32 %v2506_v8, %v684_v48 }
 0x271   :  { %v715_v46 = vmul.f32 1.442695, %v696_v40  ;;  %v705_v9 = vsub.f32 %v2488_v49, %v680_v21  ;;  %v729_v26 = vmul.f32 1.442695, %v703_v13  ;;  %v717_v53 = vmul.f32 1.442695, %v697_v44 }
 0x272   :  { %1995 = vpow2.f32 %v709_v28  ;;  %v2562_v61 = vsub.s32 4, %v2311_v29  ;;  %v699_v22 = vsub.f32 %v2466_v30, %v668_v51  ;;  %v719_v62 = vmul.f32 1.442695, %v698_v52 }
 0x273   :  { %1997 = vpow2.f32 %v711_v33  ;;  %v733_v56 = vmul.f32 1.442695, %v705_v9  ;;  %v737_v6 = vmul.f32 1.442695, %v707_v43  ;;  %v700_v8 = vsub.f32 %v2453_v37, %v668_v51 }
 0x274   :  { %1999 = vpow2.f32 %v713_v16  ;;  %v672_v17 = vrot.slane %v651_v60, %v2562_v61  ;;  %v721_v12 = vmul.f32 1.442695, %v699_v22  ;;  %v706_v9 = vsub.f32 %v2495_v57, %v680_v21 }
 0x275   :  { %2001 = vpow2.f32 %v715_v46  ;;  %v723_v33 = vmul.f32 1.442695, %v700_v8  ;;  %v2862_v22 = vmov 0.0  }
 0x276   :  { %2003 = vpow2.f32 %v729_v26  ;;  %v701_v30 = vsub.f32 %v2474_v36, %v672_v17  ;;  %v702_v60 = vsub.f32 %v2462_v23, %v672_v17  ;;  %v704_v36 = vsub.f32 %v2468_v31, %v2545_v25  ;;  %1858 = vmatprep.subr.mxu1 %v2862_v22  ;;  %1623 = vst [vmem:[#allocation13] sm:$0xff] %v2862_v22  ;;  %v105_v17 = vld [vmem:[#allocation8] sm:$0xff] }
 0x277   :  { %2005 = vpow2.f32 %v717_v53  ;;  %v708_v31 = vsub.f32 %v2514_v35, %v684_v48  ;;  %v735_v25 = vmul.f32 1.442695, %v706_v9  ;;  %1624 = vst [vmem:[#allocation13 + $0x8] sm:$0xff] %v2862_v22  ;;  %1864 = vmatprep.mubr.msk.f32.mxu1 %vm2217_vm11, %v2862_v22  ;;  %1913 = vmatprep.subr.mxu0 %v2862_v22 }
 0x278   :  { %2007 = vpow2.f32 %v733_v56  ;;  %v725_v37 = vmul.f32 1.442695, %v701_v30  ;;  %v727_v44 = vmul.f32 1.442695, %v702_v60  ;;  %v731_v26 = vmul.f32 1.442695, %v704_v36  ;;  %1929 = vmatprep.mubr.msk.f32.mxu0 %vm2217_vm11, %v2862_v22 }
 0x279   :  { %2009 = vpow2.f32 %v719_v62  ;;  %v739_v53 = vmul.f32 1.442695, %v708_v31  ;;  %v1123_v56 = vld [vmem:[#allocation10 + $0x50] sm:$0xff]  ;;  %v1122_v62 = vld [vmem:[#allocation10 + $0x48] sm:$0xff] }
 0x27a   :  { %2011 = vpow2.f32 %v737_v6  ;;  %1859 = vmatpush3.msra.mxu1 %v1123_v56  ;;  %v1121_v6 = vld [vmem:[#allocation10 + $0x40] sm:$0xff] }
 0x27b   :  { %2013 = vpow2.f32 %v721_v12  ;;  %1860 = vmatprep.subr.mxu1 %v2862_v22 }
 0x27c   :  { %2015 = vpow2.f32 %v723_v33  ;;  %1861 = vmatpush3.msra.mxu1 %v1122_v62 }
 0x27d   :  { %2017 = vpow2.f32 %v725_v37  ;;  %1862 = vmatprep.subr.mxu1 %v2862_v22 }
 0x27e   :  { %2019 = vpow2.f32 %v727_v44  ;;  %1863 = vmatpush3.msra.mxu1 %v1121_v6 }
 0x27f   :  { %v2565_v3 = vpop.eup %1995  ;;  %2021 = vpow2.f32 %v731_v26  ;;  %1865 = vmatmul.mubr.msk.f32.vlgmr.msra.gmra.mxu1 %vm1128_vm12, %v105_v17  ;;  %1867 = vmatprep.subr.mxu1 %v2862_v22 }
 0x280   :  { %v2567_v49 = vpop.eup %1997  ;;  %758 = vperm.xlu1 %1960, %v2565_v3   ;;  %2023 = vpow2.f32 %v735_v25  ;;  %1891 = vmatprep.mubr.msk.f32.mxu1 %vm2217_vm11, %v2862_v22 }
 0x281   :  { %761 = vperm.xlu0 %1961, %v2567_v49   ;;  %v2573_v28 = vpop.eup %1999  ;;  %2025 = vpow2.f32 %v739_v53 }
 0x282   :  { %v2577_v38 = vpop.eup %2001 }
 0x283   :  { %v2580_v40 = vpop.eup %2003 }
 0x284   :  { %764 = vperm.xlu1 %1960, %v2573_v28   ;;  %v2584_v16 = vpop.eup %2005 }
 0x285   :  { %788 = vperm.xlu0 %1961, %v2580_v40   ;;  %v2587_v13 = vpop.eup %2007 }
 0x286   :  { %v2592_v46 = vpop.eup %2009 }
 0x287   :  { %v2595_v23 = vpop.eup %2011 }
 0x288   :  { %767 = vperm.xlu1 %1960, %v2577_v38   ;;  %v2599_v51 = vpop.eup %2013 }
 0x289   :  { %794 = vperm.xlu0 %1961, %v2587_v13   ;;  %v2603_v52 = vpop.eup %2015 }
 0x28a   :  { %v2606_v43 = vpop.eup %2017 }
 0x28b   :  { %v2609_v57 = vpop.eup %2019 }
 0x28c   :  { %770 = vperm.xlu1 %1960, %v2584_v16   ;;  %v2612_v21 = vpop.eup %2021 }
 0x28d   :  { %800 = vperm.xlu0 %1961, %v2595_v23   ;;  %v2615_v35 = vpop.eup %2023 }
 0x28e   :  { %v2618_v48 = vpop.eup %2025 }
 0x290   :  { %773 = vperm.xlu1 %1960, %v2592_v46  }
 0x294   :  { %776 = vperm.xlu1 %1960, %v2599_v51  }
 0x298   :  { %779 = vperm.xlu1 %1960, %v2603_v52  }
 0x29c   :  { %782 = vperm.xlu1 %1960, %v2606_v43  }
 0x2a0   :  { %785 = vperm.xlu1 %1960, %v2609_v57  }
 0x2a4   :  { %791 = vperm.xlu1 %1960, %v2612_v21  }
 0x2a8   :  { %797 = vperm.xlu1 %1960, %v2615_v35  }
 0x2ac   :  { %803 = vperm.xlu1 %1960, %v2618_v48  }
 0x2fb   :  { %v759_v8 = vpop.permute.xlu1 %758 }
 0x2fc   :  { %v762_v36 = vpop.permute.xlu0 %761  ;;  %v808_v17 = vrot.slane %v759_v8, %v2445_v15 }
 0x2fd   :  { %v812_v6 = vrot.slane %v762_v36, %v2456_v19 }
 0x2ff   :  { %v765_v12 = vpop.permute.xlu1 %764  ;;  %v813_v8 = vsel %vm568_vm2, %v812_v6, %v808_v17 }
 0x300   :  { %v789_v26 = vpop.permute.xlu0 %788  ;;  %v817_v22 = vrot.slane %v765_v12, %v2445_v15 }
 0x301   :  { %v853_v12 = vrot.slane %v789_v26, %v2445_v15 }
 0x303   :  { %v768_v30 = vpop.permute.xlu1 %767 }
 0x304   :  { %v821_v25 = vrot.slane %v768_v30, %v2456_v19  ;;  %v795_v53 = vpop.permute.xlu0 %794 }
 0x306   :  { %v822_v47 = vsel %vm568_vm2, %v821_v25, %v817_v22 }
 0x307   :  { %v771_v33 = vpop.permute.xlu1 %770  ;;  %v877_v22 = vsel %vm633_vm3, %v822_v47, %v813_v8 }
 0x308   :  { %v826_v0 = vrot.slane %v771_v33, %v2445_v15 }
 0x30b   :  { %v774_v60 = vpop.permute.xlu1 %773 }
 0x30c   :  { %v830_v56 = vrot.slane %v774_v60, %v2456_v19 }
 0x30e   :  { %v831_v60 = vsel %vm568_vm2, %v830_v56, %v826_v0 }
 0x30f   :  { %v777_v37 = vpop.permute.xlu1 %776  ;;  %v878_v0 = vsel %vm635_vm4, %v831_v60, %v877_v22 }
 0x310   :  { %v835_v30 = vrot.slane %v777_v37, %v2445_v15  ;;  %v801_v37 = vpop.permute.xlu0 %800 }
 0x313   :  { %v780_v44 = vpop.permute.xlu1 %779 }
 0x314   :  { %v839_v58 = vrot.slane %v780_v44, %v2456_v19 }
 0x316   :  { %v840_v44 = vsel %vm568_vm2, %v839_v58, %v835_v30  ;;  %v871_v58 = vrot.slane %v801_v37, %v2445_v15 }
 0x317   :  { %v783_v9 = vpop.permute.xlu1 %782  ;;  %v879_v56 = vsel %vm637_vm5, %v840_v44, %v878_v0 }
 0x318   :  { %v844_v36 = vrot.slane %v783_v9, %v2445_v15 }
 0x31b   :  { %v786_v31 = vpop.permute.xlu1 %785 }
 0x31c   :  { %v848_v7 = vrot.slane %v786_v31, %v2456_v19  ;;  %v862_v31 = vrot.slane %v795_v53, %v2445_v15 }
 0x31e   :  { %v849_v25 = vsel %vm568_vm2, %v848_v7, %v844_v36 }
 0x31f   :  { %v792_v62 = vpop.permute.xlu1 %791 }
 0x320   :  { %v857_v54 = vrot.slane %v792_v62, %v2456_v19 }
 0x322   :  { %v858_v9 = vsel %vm568_vm2, %v857_v54, %v853_v12  ;;  %v2875_v12 = vsub.s32 1, %v2311_v29 }
 0x323   :  { %v798_v27 = vpop.permute.xlu1 %797 }
 0x324   :  { %v866_v33 = vrot.slane %v798_v27, %v2456_v19  ;;  %v880_v27 = vsel %vm639_vm6, %v849_v25, %v879_v56 }
 0x325   :  { %v881_v47 = vsel %vm641_vm7, %v858_v9, %v880_v27 }
 0x326   :  { %v867_v62 = vsel %vm568_vm2, %v866_v33, %v862_v31 }
 0x327   :  { %v804_v26 = vpop.permute.xlu1 %803  ;;  %v882_v7 = vsel %vm643_vm8, %v867_v62, %v881_v47 }
 0x328   :  { %v875_v53 = vrot.slane %v804_v26, %v2456_v19 }
 0x32a   :  { %v876_v6 = vsel %vm568_vm2, %v875_v53, %v871_v58  ;;  %vm1712_vm2 = vcmask 654848  }
 0x32b   :  { %v883_v17 = vsel %vm645_vm9, %v876_v6, %v882_v7 }
 0x32c   :  { %v885_v54 = vsel %vm648_vm10, %v883_v17, 0.0  ;;  %v2876_v17 = vmov 0.0  }
 0x32d   :  { %886 = vadd.xlane.f32.xlu0 %v885_v54  ;;  %v1231_v54 = vld [vmem:[#allocation10 + $0x78] sm:$0xff] }
 0x33f   :  { %v1198_v30 = vpop.f32.mrf.mxu1 }
 0x341   :  { %v1866_v60 = vpop.f32.mrf.mxu1 }
 0x342   :  { %v1229_v60 = vld [vmem:[#allocation10 + $0x68] sm:$0xff] }
 0x3b6   :  { %v887_v36 = vpop.xlane.xlu0 %886 }
 0x3b7   :  { %v908_v15 = vrot.slane %v887_v36, %v2562_v61  ;;  %v892_v8 = vrot.slane %v887_v36, %v2318_v34  ;;  %v920_v19 = vrot.slane %v887_v36, %v2350_v63  ;;  %v896_v44 = vrot.slane %v887_v36, %v2875_v12 }
 0x3b8   :  { %v900_v33 = vrot.slane %v887_v36, %v2538_v11  ;;  %v1127_v34 = vrot.slane %v2307_v24, %v2538_v11  ;;  %v904_v56 = vrot.slane %v887_v36, %v2553_v42  ;;  %v916_v27 = vrot.slane %v887_v36, %v2542_v18 }
 0x3b9   :  { %2027 = vrcp.f32 %v908_v15  ;;  %v1227_v15 = vld [vmem:[#allocation10 + $0x58] sm:$0xff] }
 0x3ba   :  { %2029 = vrcp.f32 %v892_v8  ;;  %v2679_v26 = vadd.f32 %v1198_v30, %v1127_v34  ;;  %v1230_v30 = vld [vmem:[#allocation10 + $0x70] sm:$0xff]  ;;  %v1629_v8 = vadd.s32 4294967232, %v2438_v4 }
 0x3bb   :  { %2031 = vrcp.f32 %v920_v19  ;;  %v1634_v19 = vadd.s32 4294967224, %v2438_v4 }
 0x3bc   :  { %2033 = vrcp.f32 %v896_v44  ;;  %v2716_v44 = vsub.s32 %v1629_v8, %v2311_v29 }
 0x3bd   :  { %2035 = vrcp.f32 %v900_v33  ;;  %v2719_v33 = vsub.s32 %v1634_v19, %v2311_v29 }
 0x3be   :  { %2037 = vrcp.f32 %v904_v56 }
 0x3c6   :  { %v2028_v31 = vpop.eup %2027 }
 0x3c7   :  { %v2030_v22 = vpop.eup %2029  ;;  %v942_v37 = vmul.f32 %v2028_v31, %v2606_v43  ;;  %v943_v53 = vmul.f32 %v2028_v31, %v2609_v57  ;;  %v1238_v57 = vld [vmem:[#allocation10 + $0xb0] sm:$0xff] }
 0x3c8   :  { %v2032_v25 = vpop.eup %2031  ;;  %v930_v0 = vmul.f32 %v2030_v22, %v2565_v3  ;;  %v931_v9 = vmul.f32 %v2030_v22, %v2567_v49  ;;  %v912_v49 = vrot.slane %v887_v36, %v2533_v2  ;;  %1868 = vmatpush3.msra.mxu1 %v1238_v57  ;;  %v1228_v36 = vld [vmem:[#allocation10 + $0x60] sm:$0xff] }
 0x3c9   :  { %995 = vperm.xlu0 %1961, %v942_v37   ;;  %v951_v63 = vmul.f32 %v2032_v25, %v2595_v23  ;;  %v2034_v62 = vpop.eup %2033  ;;  %1869 = vmatprep.subr.mxu1 %v2876_v17 }
 0x3ca   :  { %955 = vperm.xlu1 %1960, %v930_v0   ;;  %v933_v43 = vmul.f32 %v2034_v62, %v2573_v28  ;;  %v934_v24 = vmul.f32 %v2034_v62, %v2577_v38  ;;  %v2036_v11 = vpop.eup %2035  ;;  %2039 = vrcp.f32 %v912_v49 }
 0x3cb   :  { %v936_v3 = vmul.f32 %v2036_v11, %v2584_v16  ;;  %v937_v28 = vmul.f32 %v2036_v11, %v2592_v46  ;;  %v2038_v23 = vpop.eup %2037  ;;  %2041 = vrcp.f32 %v916_v27 }
 0x3cc   :  { %v939_v58 = vmul.f32 %v2038_v23, %v2599_v51  ;;  %v940_v38 = vmul.f32 %v2038_v23, %v2603_v52  ;;  %v952_v52 = vmul.f32 %v2032_v25, %v2618_v48  ;;  %v1233_v48 = vld [vmem:[#allocation10 + $0x88] sm:$0xff] }
 0x3cd   :  { %1025 = vperm.xlu0 %1961, %v951_v63  }
 0x3ce   :  { %960 = vperm.xlu1 %1960, %v931_v9  }
 0x3d1   :  { %1219 = vrot.lane.b32.xlu0 %v2679_v26, %s2218_s30 }
 0x3d2   :  { %965 = vperm.xlu1 %1960, %v933_v43  }
 0x3d5   :  { %1317 = vrot.lane.b32.xlu0 %v2314_v32, %s2218_s30 }
 0x3d6   :  { %970 = vperm.xlu1 %1960, %v934_v24  }
 0x3d7   :  { %v2040_v16 = vpop.eup %2039 }
 0x3d8   :  { %v945_v47 = vmul.f32 %v2040_v16, %v2580_v40  ;;  %v946_v46 = vmul.f32 %v2040_v16, %v2612_v21  ;;  %v2042_v6 = vpop.eup %2041  ;;  %v1237_v40 = vld [vmem:[#allocation10 + $0xa8] sm:$0xff]  ;;  %v1236_v21 = vld [vmem:[#allocation10 + $0xa0] sm:$0xff] }
 0x3d9   :  { %v948_v51 = vmul.f32 %v2042_v6, %v2587_v13  ;;  %v949_v7 = vmul.f32 %v2042_v6, %v2615_v35  ;;  %1870 = vmatpush3.msra.mxu1 %v1237_v40  ;;  %v1235_v13 = vld [vmem:[#allocation10 + $0x98] sm:$0xff]  ;;  %v1234_v35 = vld [vmem:[#allocation10 + $0x90] sm:$0xff] }
 0x3da   :  { %975 = vperm.xlu1 %1960, %v936_v3   ;;  %1871 = vmatprep.subr.mxu1 %v2876_v17 }
 0x3db   :  { %1872 = vmatpush3.msra.mxu1 %v1236_v21 }
 0x3dc   :  { %1873 = vmatprep.subr.mxu1 %v2876_v17 }
 0x3dd   :  { %1874 = vmatpush3.msra.mxu1 %v1235_v13 }
 0x3de   :  { %980 = vperm.xlu1 %1960, %v937_v28   ;;  %1875 = vmatprep.subr.mxu1 %v2876_v17 }
 0x3df   :  { %1876 = vmatpush3.msra.mxu1 %v1234_v35 }
 0x3e0   :  { %1877 = vmatprep.subr.mxu1 %v2876_v17 }
 0x3e1   :  { %1878 = vmatpush3.msra.mxu1 %v1233_v48 }
 0x3e2   :  { %985 = vperm.xlu1 %1960, %v939_v58   ;;  %1879 = vmatprep.subr.mxu1 %v2876_v17 }
 0x3e6   :  { %990 = vperm.xlu1 %1960, %v940_v38  }
 0x3ea   :  { %1000 = vperm.xlu1 %1960, %v943_v53  }
 0x3ee   :  { %1005 = vperm.xlu1 %1960, %v945_v47  }
 0x3f2   :  { %1010 = vperm.xlu1 %1960, %v946_v46  }
 0x3f6   :  { %1015 = vperm.xlu1 %1960, %v948_v51  }
 0x3fa   :  { %1020 = vperm.xlu1 %1960, %v949_v7  }
 0x3fe   :  { %1030 = vperm.xlu1 %1960, %v952_v52  }
 0x402   :  { %1222 = vrot.lane.b32.xlu1 %v2314_v32, %s2219_s8  ;;  %v1232_v32 = vld [vmem:[#allocation10 + $0x80] sm:$0xff] }
 0x403   :  { %1880 = vmatpush3.msra.mxu1 %v1232_v32 }
 0x404   :  { %1881 = vmatprep.subr.mxu1 %v2876_v17 }
 0x405   :  { %1882 = vmatpush3.msra.mxu1 %v1231_v54 }
 0x406   :  { %1883 = vmatprep.subr.mxu1 %v2876_v17 }
 0x407   :  { %1884 = vmatpush3.msra.mxu1 %v1230_v30 }
 0x408   :  { %1885 = vmatprep.subr.mxu1 %v2876_v17 }
 0x409   :  { %1886 = vmatpush3.msra.mxu1 %v1229_v60 }
 0x40a   :  { %1887 = vmatprep.subr.mxu1 %v2876_v17 }
 0x40b   :  { %1888 = vmatpush3.msra.mxu1 %v1228_v36 }
 0x40c   :  { %1889 = vmatprep.subr.mxu1 %v2876_v17 }
 0x40d   :  { %1890 = vmatpush3.msra.mxu1 %v1227_v15 }
 0x40e   :  { %1894 = vmatprep.subr.mxu1 %v2876_v17 }
 0x444   :  { %v996_v58 = vpop.permute.xlu0 %995 }
 0x445   :  { %v956_v12 = vpop.permute.xlu1 %955 }
 0x446   :  { %v1633_v22 = vrot.slane %v956_v12, %v2716_v44  ;;  %v1033_v7 = vmul.f32 %v956_v12, %v2330_v45 }
 0x448   :  { %v1049_v30 = vsel %vm471_vm1, %v1033_v7, 0.0  ;;  %v2879_v7 = vld [vmem:[#allocation20_spill] sm:$0xff] }
 0x449   :  { %v961_v31 = vpop.permute.xlu1 %960 }
 0x44a   :  { %v1638_v37 = vrot.slane %v961_v31, %v2719_v33  ;;  %v1034_v47 = vmul.f32 %v961_v31, %v2326_v41 }
 0x44c   :  { %v1640_v25 = vsel %vm1639_vm13, %v1638_v37, %v1633_v22  ;;  %v1050_v45 = vsel %vm471_vm1, %v1034_v47, 0.0 }
 0x44d   :  { %v966_v0 = vpop.permute.xlu1 %965  ;;  %v1051_v15 = vadd.f32 %v1050_v45, %v1049_v30  ;;  %v2881_v30 = vld [vmem:[#allocation22_spill] sm:$0xff] }
 0x44e   :  { %v1644_v63 = vrot.slane %v966_v0, %v2716_v44  ;;  %v1035_v27 = vmul.f32 %v966_v0, %v2342_v55  ;;  %v2877_v0 = vld [vmem:[#allocation19_spill] sm:$0xff] }
 0x450   :  { %v1058_v40 = vsel %vm471_vm1, %v1035_v27, 0.0 }
 0x451   :  { %v971_v34 = vpop.permute.xlu1 %970 }
 0x452   :  { %v1648_v4 = vrot.slane %v971_v34, %v2719_v33  ;;  %v1036_v28 = vmul.f32 %v971_v34, %v2337_v50  ;;  %v1671_v50 = vrot.slane %v996_v58, %v2716_v44 }
 0x454   :  { %v1649_v9 = vsel %vm1639_vm13, %v1648_v4, %v1644_v63  ;;  %v1059_v46 = vsel %vm471_vm1, %v1036_v28, 0.0  ;;  %v1052_v4 = vrot.slane %v1051_v15, 4 }
 0x455   :  { %v1704_v56 = vsel %vm633_vm3, %v1649_v9, %v1640_v25  ;;  %v976_v29 = vpop.permute.xlu1 %975  ;;  %v1060_v13 = vadd.f32 %v1059_v46, %v1058_v40 }
 0x456   :  { %v1653_v43 = vrot.slane %v976_v29, %v2716_v44  ;;  %v1037_v55 = vmul.f32 %v976_v29, %v2354_v1  ;;  %v1053_v28 = vadd.f32 %v1052_v4, %v1051_v15 }
 0x457   :  { %v1061_v8 = vrot.slane %v1060_v13, 4 }
 0x458   :  { %v1067_v32 = vsel %vm471_vm1, %v1037_v55, 0.0 }
 0x459   :  { %v981_v62 = vpop.permute.xlu1 %980  ;;  %v1062_v9 = vadd.f32 %v1061_v8, %v1060_v13 }
 0x45a   :  { %v1657_v24 = vrot.slane %v981_v62, %v2719_v33  ;;  %v1038_v16 = vmul.f32 %v981_v62, %v2346_v59 }
 0x45c   :  { %v1658_v11 = vsel %vm1639_vm13, %v1657_v24, %v1653_v43  ;;  %v1068_v35 = vsel %vm471_vm1, %v1038_v16, 0.0  ;;  %v2878_v16 = vld [vmem:[#allocation21_spill] sm:$0xff] }
 0x45d   :  { %v1705_v3 = vsel %vm635_vm4, %v1658_v11, %v1704_v56  ;;  %v986_v49 = vpop.permute.xlu1 %985  ;;  %v1069_v60 = vadd.f32 %v1068_v35, %v1067_v32 }
 0x45e   :  { %v1662_v38 = vrot.slane %v986_v49, %v2716_v44  ;;  %v1039_v59 = vmul.f32 %v986_v49, %v2366_v10 }
 0x45f   :  { %v1070_v37 = vrot.slane %v1069_v60, 4 }
 0x461   :  { %v991_v23 = vpop.permute.xlu1 %990  ;;  %v1071_v49 = vadd.f32 %v1070_v37, %v1069_v60 }
 0x462   :  { %v1666_v53 = vrot.slane %v991_v23, %v2719_v33  ;;  %v1040_v6 = vmul.f32 %v991_v23, %v2358_v5  ;;  %v1041_v5 = vmul.f32 %v996_v58, %v2376_v20  ;;  %v1076_v20 = vsel %vm471_vm1, %v1039_v59, 0.0 }
 0x463   :  { %v1063_v23 = vrot.slane %v1062_v9, 2  ;;  %v1054_v59 = vrot.slane %v1053_v28, 2 }
 0x464   :  { %v1667_v51 = vsel %vm1639_vm13, %v1666_v53, %v1662_v38  ;;  %v1077_v1 = vsel %vm471_vm1, %v1040_v6, 0.0  ;;  %v1085_v36 = vsel %vm471_vm1, %v1041_v5, 0.0  ;;  %v1026_v38 = vpop.permute.xlu0 %1025 }
 0x465   :  { %v1706_v52 = vsel %vm637_vm5, %v1667_v51, %v1705_v3  ;;  %v1001_v57 = vpop.permute.xlu1 %1000  ;;  %v1078_v19 = vadd.f32 %v1077_v1, %v1076_v20  ;;  %v1072_v51 = vrot.slane %v1071_v49, 2  ;;  %v1055_v15 = vadd.f32 %v1054_v59, %v1053_v28 }
 0x466   :  { %v1042_v41 = vmul.f32 %v1001_v57, %v2371_v14  ;;  %v1675_v21 = vrot.slane %v1001_v57, %v2719_v33  ;;  %v2880_v57 = vld [vmem:[#allocation23_spill] sm:$0xff] }
 0x467   :  { %v1079_v56 = vrot.slane %v1078_v19, 4  ;;  %v1047_v40 = vmul.f32 %v1026_v38, %v2880_v57  ;;  %v1056_v4 = vrot.slane %v1055_v15, 1 }
 0x468   :  { %v1676_v48 = vsel %vm1639_vm13, %v1675_v21, %v1671_v50  ;;  %v1086_v54 = vsel %vm471_vm1, %v1042_v41, 0.0  ;;  %v1064_v41 = vadd.f32 %v1063_v23, %v1062_v9 }
 0x469   :  { %v1707_v10 = vsel %vm639_vm6, %v1676_v48, %v1706_v52  ;;  %v1006_v14 = vpop.permute.xlu1 %1005  ;;  %v1087_v12 = vadd.f32 %v1086_v54, %v1085_v36  ;;  %v1080_v58 = vadd.f32 %v1079_v56, %v1078_v19  ;;  %v1112_v36 = vsel %vm471_vm1, %v1047_v40, 0.0 }
 0x46a   :  { %v1043_v31 = vmul.f32 %v1006_v14, %v2388_v39  ;;  %v1680_v25 = vrot.slane %v1006_v14, %v2716_v44  ;;  %v1073_v14 = vadd.f32 %v1072_v51, %v1071_v49 }
 0x46b   :  { %v1088_v29 = vrot.slane %v1087_v12, 4  ;;  %v1081_v21 = vrot.slane %v1080_v58, 2 }
 0x46c   :  { %v1094_v62 = vsel %vm471_vm1, %v1043_v31, 0.0 }
 0x46d   :  { %v1011_v22 = vpop.permute.xlu1 %1010  ;;  %v1089_v53 = vadd.f32 %v1088_v29, %v1087_v12  ;;  %v1082_v8 = vadd.f32 %v1081_v21, %v1080_v58  ;;  %v1065_v12 = vrot.slane %v1064_v41, 1 }
 0x46e   :  { %v1044_v34 = vmul.f32 %v1011_v22, %v2877_v0  ;;  %v1684_v63 = vrot.slane %v1011_v22, %v2719_v33 }
 0x46f   :  { %v1090_v5 = vrot.slane %v1089_v53, 2 }
 0x470   :  { %v1095_v43 = vsel %vm471_vm1, %v1044_v34, 0.0  ;;  %v1685_v24 = vsel %vm1639_vm13, %v1684_v63, %v1680_v25  ;;  %v1074_v63 = vrot.slane %v1073_v14, 1 }
 0x471   :  { %v1096_v11 = vadd.f32 %v1095_v43, %v1094_v62  ;;  %v1708_v39 = vsel %vm641_vm7, %v1685_v24, %v1707_v10  ;;  %v1016_v3 = vpop.permute.xlu1 %1015  ;;  %v1698_v10 = vrot.slane %v1026_v38, %v2716_v44  ;;  %v1091_v31 = vadd.f32 %v1090_v5, %v1089_v53  ;;  %v1327_v5 = vld [vmem:[#allocation10 + $0xe8] sm:$0xff] }
 0x472   :  { %v1045_v47 = vmul.f32 %v1016_v3, %v2878_v16  ;;  %v1689_v50 = vrot.slane %v1016_v3, %v2716_v44  ;;  %v1066_v62 = vadd.f32 %v1065_v12, %v1064_v41  ;;  %v1057_v3 = vadd.f32 %v1056_v4, %v1055_v15  ;;  %v1328_v41 = vld [vmem:[#allocation10 + $0xf0] sm:$0xff] }
 0x473   :  { %v1097_v27 = vrot.slane %v1096_v11, 4  ;;  %v1092_v29 = vrot.slane %v1091_v31, 1 }
 0x474   :  { %v1103_v13 = vsel %vm471_vm1, %v1045_v47, 0.0 }
 0x475   :  { %v1098_v46 = vadd.f32 %v1097_v27, %v1096_v11  ;;  %v1021_v6 = vpop.permute.xlu1 %1020  ;;  %v1093_v58 = vadd.f32 %v1092_v29, %v1091_v31  ;;  %v1210_v27 = vsel %vm633_vm3, %v1066_v62, %v1057_v3  ;;  %v1448_v29 = vld [vmem:[#allocation10 + $0x128] sm:$0xff]  ;;  %v1447_v62 = vld [vmem:[#allocation10 + $0x120] sm:$0xff] }
 0x476   :  { %v1046_v55 = vmul.f32 %v1021_v6, %v2879_v7  ;;  %v1693_v52 = vrot.slane %v1021_v6, %v2719_v33  ;;  %v1443_v3 = vld [vmem:[#allocation10 + $0x100] sm:$0xff] }
 0x477   :  { %v1099_v1 = vrot.slane %v1098_v46, 2 }
 0x478   :  { %v1104_v35 = vsel %vm471_vm1, %v1046_v55, 0.0  ;;  %v1694_v45 = vsel %vm1639_vm13, %v1693_v52, %v1689_v50  ;;  %v1220_v50 = vpop.permute.xlu0 %1219 }
 0x479   :  { %v1105_v48 = vadd.f32 %v1104_v35, %v1103_v13  ;;  %v1709_v32 = vsel %vm643_vm8, %v1694_v45, %v1708_v39  ;;  %v1031_v54 = vpop.permute.xlu1 %1030  ;;  %v1100_v25 = vadd.f32 %v1099_v1, %v1098_v46  ;;  %v1075_v39 = vadd.f32 %v1074_v63, %v1073_v14  ;;  %v1326_v13 = vld [vmem:[#allocation10 + $0xe0] sm:$0xff]  ;;  %v1325_v35 = vld [vmem:[#allocation10 + $0xd8] sm:$0xff]  ;;  %v1324_v45 = vld [vmem:[#allocation10 + $0xd0] sm:$0xff] }
 0x47a   :  { %v1048_v60 = vmul.f32 %v1031_v54, %v2881_v30  ;;  %v1702_v20 = vrot.slane %v1031_v54, %v2719_v33  ;;  %v1083_v33 = vrot.slane %v1082_v8, 1  ;;  %v1323_v1 = vld [vmem:[#allocation10 + $0xc8] sm:$0xff]  ;;  %v104_v54 = vld [vmem:[#allocation7] sm:$0xff] }
 0x47b   :  { %v1106_v19 = vrot.slane %v1105_v48, 4  ;;  %v1101_v43 = vrot.slane %v1100_v25, 1  ;;  %v1211_v47 = vsel %vm635_vm4, %v1075_v39, %v1210_v27  ;;  %1414 = vrot.lane.b32.xlu0 %v104_v54, %s2218_s30 }
 0x47c   :  { %v1113_v22 = vsel %vm471_vm1, %v1048_v60, 0.0  ;;  %v1703_v37 = vsel %vm1639_vm13, %v1702_v20, %v1698_v10  ;;  %v1084_v49 = vadd.f32 %v1083_v33, %v1082_v8  ;;  %v2812_v10 = vld [vmem:[%s2860_s6] sm:$0xff]  ;;  %v1318_v60 = vpop.permute.xlu0 %1317  ;;  %s2220_s6 = smov [#allocation13]  }
 0x47d   :  { %v1107_v0 = vadd.f32 %v1106_v19, %v1105_v48  ;;  %v1114_v34 = vadd.f32 %v1113_v22, %v1112_v36  ;;  %v2784_v44 = vsel %vm645_vm9, %v1703_v37, %v1709_v32  ;;  %v1102_v38 = vadd.f32 %v1101_v43, %v1100_v25  ;;  %v1223_v57 = vpop.permute.xlu1 %1222  ;;  %v1322_v48 = vld [vmem:[#allocation10 + $0xc0] sm:$0xff]  ;;  %v1321_v32 = vld [vmem:[#allocation10 + $0xb8] sm:$0xff]  ;;  %s1720_s11 = sshll.u32 %s2220_s6, 4  ;;  %s1721_s11 = int_to_ptr.vmem [resolvable:$true] %s1720_s11 }
 0x47e   :  { %v1212_v6 = vsel %vm637_vm5, %v1084_v49, %v1211_v47  ;;  %v1242_v14 = vrot.slane %v2812_v10, %v2553_v42  ;;  %v1332_v8 = vrot.slane %v2812_v10, %v2562_v61  ;;  %v1446_v43 = vld [vmem:[#allocation10 + $0x118] sm:$0xff]  ;;  %v1529_v47 = vld [vmem:[#allocation11 + $0x8] sm:$0xff]  ;;  %s2176_s12 = scalar_lea.vmem %s1721_s11, 256  ;;  %p2181_p3 = scmp.lt.s32.totalorder %s1721_s11, %s1721_s11 }
 0x47f   :  { %v1108_v9 = vrot.slane %v1107_v0, 2  ;;  %v1115_v56 = vrot.slane %v1114_v34, 4  ;;  %v1213_v51 = vsel %vm639_vm6, %v1093_v58, %v1212_v6  ;;  %v1442_v49 = vld [vmem:[#allocation10 + $0xf8] sm:$0xff]  ;;  %v1453_v6 = vrot.slane %v2812_v10, %v2533_v2  ;;  %p2177_p2 = scmp.ne.s32.totalorder %s1721_s11, %s2176_s12  ;;  %p2182_p4 = scmp.lt.s32.totalorder %s2176_s12, %s2176_s12 }
 0x480   :  { %v1214_v55 = vsel %vm641_vm7, %v1102_v38, %v1213_v51 }
 0x481   :  { %v1109_v24 = vadd.f32 %v1108_v9, %v1107_v0  ;;  %v1116_v11 = vadd.f32 %v1115_v56, %v1114_v34  ;;  %v1449_v56 = vld [vmem:[#allocation10 + $0x130] sm:$0xff]  ;;  %p2183_p5 = por %p2182_p4, %p2181_p3 }
 0x482   :  { %1914 = vmatpush3.msra.mxu0 %v1449_v56 }
 0x483   :  { %v1110_v28 = vrot.slane %v1109_v24, 1  ;;  %v1117_v23 = vrot.slane %v1116_v11, 2  ;;  %1915 = vmatprep.subr.mxu0 %v2876_v17  ;;  %p2184_p6 = pnand %p2183_p5, %p2177_p2 }
 0x484   :  { %1916 = vmatpush3.msra.mxu0 %v1448_v29 }
 0x485   :  { %v1118_v53 = vadd.f32 %v1117_v23, %v1116_v11  ;;  %v1111_v16 = vadd.f32 %v1110_v28, %v1109_v24  ;;  %1917 = vmatprep.subr.mxu0 %v2876_v17  ;;  %v1445_v24 = vld [vmem:[#allocation10 + $0x110] sm:$0xff]  ;;  %v1444_v11 = vld [vmem:[#allocation10 + $0x108] sm:$0xff] }
 0x486   :  { %1918 = vmatpush3.msra.mxu0 %v1447_v62  ;;  %v1531_v28 = vld [vmem:[#allocation11 + $0x18] sm:$0xff] }
 0x487   :  { %v1119_v46 = vrot.slane %v1118_v53, 1  ;;  %v1215_v52 = vsel %vm643_vm8, %v1111_v16, %v1214_v55  ;;  %1919 = vmatprep.subr.mxu0 %v2876_v17  ;;  %v1530_v16 = vld [vmem:[#allocation11 + $0x10] sm:$0xff] }
 0x488   :  { %1920 = vmatpush3.msra.mxu0 %v1446_v43 }
 0x489   :  { %v1120_v7 = vadd.f32 %v1119_v46, %v1118_v53  ;;  %1921 = vmatprep.subr.mxu0 %v2876_v17  ;;  %v1528_v46 = vld [vmem:[#allocation11] sm:$0xff] }
 0x48a   :  { %1922 = vmatpush3.msra.mxu0 %v1445_v24 }
 0x48b   :  { %v2793_v40 = vsel %vm645_vm9, %v1120_v7, %v1215_v52  ;;  %1923 = vmatprep.subr.mxu0 %v2876_v17 }
 0x48c   :  { %v1225_v59 = vsel %vm471_vm1, %v2793_v40, %v1220_v50  ;;  %1924 = vmatpush3.msra.mxu0 %v1444_v11 }
 0x48d   :  { %v1226_v21 = vsel %vm135_vm0, %v1225_v59, %v1223_v57  ;;  %1925 = vmatprep.subr.mxu0 %v2876_v17 }
 0x48e   :  { %1892 = vmatmul.mubr.msk.f32.vlgmr.msra.gmra.mxu1 %vm1243_vm14, %v1226_v21  ;;  %1926 = vmatpush3.msra.mxu0 %v1443_v3 }
 0x48f   :  { %1895 = vmatpush3.msra.mxu1 %v1328_v41  ;;  %1910 = vmatprep.mubr.msk.f32.mxu1 %vm2217_vm11, %v2876_v17 }
 0x490   :  { %1896 = vmatprep.subr.mxu1 %v2876_v17  ;;  %1927 = vmatprep.subr.mxu0 %v2876_v17 }
 0x491   :  { %1897 = vmatpush3.msra.mxu1 %v1327_v5  ;;  %1928 = vmatpush3.msra.mxu0 %v1442_v49 }
 0x492   :  { %1898 = vmatprep.subr.mxu1 %v2876_v17 }
 0x493   :  { %1899 = vmatpush3.msra.mxu1 %v1326_v13 }
 0x494   :  { %1900 = vmatprep.subr.mxu1 %v2876_v17 }
 0x495   :  { %1901 = vmatpush3.msra.mxu1 %v1325_v35 }
 0x496   :  { %1902 = vmatprep.subr.mxu1 %v2876_v17 }
 0x497   :  { %1903 = vmatpush3.msra.mxu1 %v1324_v45 }
 0x498   :  { %1904 = vmatprep.subr.mxu1 %v2876_v17 }
 0x499   :  { %1905 = vmatpush3.msra.mxu1 %v1323_v1 }
 0x49a   :  { %1906 = vmatprep.subr.mxu1 %v2876_v17 }
 0x49b   :  { %1907 = vmatpush3.msra.mxu1 %v1322_v48 }
 0x49c   :  { %1908 = vmatprep.subr.mxu1 %v2876_v17 }
 0x49d   :  { %1909 = vmatpush3.msra.mxu1 %v1321_v32 }
 0x49e   :  { %1932 = vmatprep.subr.mxu1 %v2876_v17 }
 0x4ed   :  { %v1415_v4 = vpop.permute.xlu0 %1414 }
 0x54e   :  { %v1313_v30 = vpop.f32.mrf.mxu1 }
 0x54f   :  { %v1314_v20 = vadd.f32 %v1313_v30, %v1242_v14 }
 0x550   :  { %v1893_v36 = vpop.f32.mrf.mxu1 }
 0x551   :  { %v1320_v15 = vsel %vm471_vm1, %v1314_v20, %v1318_v60 }
 0x552   :  { %1911 = vmatmul.mubr.msk.f32.vlgmr.msra.gmra.mxu1 %vm135_vm0, %v1320_v15 }
 0x553   :  { %1940 = vmatprep.mubr.msk.f32.mxu1 %vm2217_vm11, %v2876_v17  ;;  %1933 = vmatpush3.msra.mxu1 %v1531_v28 }
 0x554   :  { %1934 = vmatprep.subr.mxu1 %v2876_v17 }
 0x555   :  { %1935 = vmatpush3.msra.mxu1 %v1530_v16 }
 0x556   :  { %1936 = vmatprep.subr.mxu1 %v2876_v17 }
 0x557   :  { %1937 = vmatpush3.msra.mxu1 %v1529_v47 }
 0x558   :  { %1938 = vmatprep.subr.mxu1 %v2876_v17 }
 0x559   :  { %1939 = vmatpush3.msra.mxu1 %v1528_v46 }
 0x612   :  { %v1402_v19 = vpop.f32.mrf.mxu1 }
 0x613   :  { %v1403_v12 = vadd.f32 %v1402_v19, %v1332_v8 }
 0x614   :  { %v1912_v31 = vpop.f32.mrf.mxu1 }
 0x615   :  { %2043 = vtanh.f32 %v1403_v12  ;;  %v1751_v42 = vmul.f32 -1.442695, %v1403_v12 }
 0x617   :  { %2045 = vpow2.f32 %v1751_v42 }
 0x622   :  { %v2044_v22 = vpop.eup %2043 }
 0x623   :  { %1419 = vrot.lane.b32.xlu1 %v2044_v22, %s2219_s8 }
 0x624   :  { %v2046_v37 = vpop.eup %2045 }
 0x625   :  { %v1409_v25 = vadd.f32 1.0, %v2046_v37 }
 0x627   :  { %2047 = vrcp.f32 %v1409_v25 }
 0x634   :  { %v2048_v0 = vpop.eup %2047 }
 0x635   :  { %v1417_v33 = vmul.f32 %v2048_v0, %v1415_v4 }
 0x695   :  { %v1420_v34 = vpop.permute.xlu1 %1419 }
 0x696   :  { %v1422_v63 = vmul.f32 %v2048_v0, %v1420_v34 }
 0x698   :  { %1424 = vrot.lane.b32.xlu1 %v1422_v63, %s2218_s30 }
 0x70a   :  { %v1425_v61 = vpop.permute.xlu1 %1424 }
 0x70b   :  { %v1427_v9 = vadd.f32 %v1425_v61, %v1417_v33 }
 0x70d   :  { %2049 = vtanh.f32 %v1427_v9 }
 0x71a   :  { %v2050_v39 = vpop.eup %2049 }
 0x71b   :  { %1430 = vrot.lane.b32.xlu0 %v2050_v39, %s2219_s8 }
 0x71f   :  { %1438 = vrot.lane.b32.xlu0 %v2793_v40, %s2218_s30 }
 0x78d   :  { %v1431_v23 = vpop.permute.xlu0 %1430 }
 0x78e   :  { %v1433_v58 = vmul.f32 %v2048_v0, %v1431_v23 }
 0x790   :  { %1435 = vrot.lane.b32.xlu1 %v1433_v58, %s2218_s30 }
 0x791   :  { %v1439_v27 = vpop.permute.xlu0 %1438 }
 0x802   :  { %v1436_v38 = vpop.permute.xlu1 %1435 }
 0x803   :  { %v1441_v53 = vsel %vm471_vm1, %v1436_v38, %v1439_v27  ;;  %1626 = vst.msk [vmem:[#allocation13 + $0x8] sm:$0xff] %vm471_vm1, %v1436_v38 }
 0x804   :  { %1930 = vmatmul.mubr.msk.f32.vlgmr.msra.gmra.mxu0 %vm135_vm0, %v1441_v53  ;;  %1628 = vst.msk [vmem:[#allocation13 + $0x8] sm:$0xff] %vm1627_vm15, %v1427_v9  ;;  %vm1610_vm0 = vcmask 326656  }
 0x805   :  { %1713 = vst.msk [vmem:[#allocation13 + $0x8] sm:$0xff] %vm1712_vm2, %v2784_v44  ;;  %v1608_v44 = vrot.slane %v2812_v10, %v2542_v18 }
 0x8c4   :  { %v1523_v51 = vpop.f32.mrf.mxu0 }
 0x8c5   :  { %v1524_v50 = vadd.f32 %v1523_v51, %v1453_v6 }
 0x8c6   :  { %v1931_v7 = vpop.f32.mrf.mxu0 }
 0x8c7   :  { %v1527_v55 = vadd.f32 %v1524_v50, %v2679_v26 }
 0x8c9   :  { %1941 = vmatmul.mubr.msk.f32.vlgmr.msra.gmra.mxu1 %vm471_vm1, %v1527_v55 }
 0x989   :  { %v1601_v52 = vpop.f32.mrf.mxu1 }
 0x98a   :  { %v1609_v57 = vadd.f32 %v1608_v44, %v1601_v52 }
 0x98b   :  { %v1942_v40 = vpop.f32.mrf.mxu1 }
 0x98c   :  { %v1611_v17 = vsel %vm1610_vm0, %v1609_v57, -inf }
 0x98d   :  { %1612 = vmax.xlane.f32.xlu1 %v1611_v17 }
 0xa16   :  { %v1613_v59 = vpop.xlane.xlu1 %1612 }
 0xa17   :  { %v1614_v41 = vsub.f32 %v1609_v57, %v1613_v59 }
 0xa19   :  { %v1615_v2 = vmul.f32 1.442695, %v1614_v41 }
 0xa1b   :  { %2051 = vpow2.f32 %v1615_v2 }
 0xa28   :  { %v2052_v21 = vpop.eup %2051 }
 0xa29   :  { %v1617_v5 = vsel %vm1610_vm0, %v2052_v21, 0.0 }
 0xa2a   :  { %1618 = vadd.xlane.f32.xlu0 %v1617_v5 }
 0xab3   :  { %v1619_v26 = vpop.xlane.xlu0 %1618 }
 0xab4   :  { %2053 = vlog2.f32 %v1619_v26 }
 0xac1   :  { %v2054_v13 = vpop.eup %2053 }
 0xac2   :  { %v1621_v18 = vmul.f32 0.6931472, %v2054_v13 }
 0xac4   :  { %v1622_v35 = vsub.f32 %v1614_v41, %v1621_v18 }
 0xac6   :  { %1625 = vst.msk [vmem:[#allocation13] sm:$0xff] %vm1610_vm0, %v1622_v35 }
 0xac7   :  { %2187 = shalt.err (!%p2184_p6)
}
 0xac8   :  { %1723 = dma.vmem_to_hbm [thread:$0]  %s1721_s11, 256, %s2861_s7, [#allocation4]  }
 0xac9   :  { %2204 = dma.done.wait [#allocation4], 256  }
 0xaca   :  { %2205 = vsyncadd [#allocation4], 4294967040 }
 0xacb   :  { %1727 = vsyncpa [#allocation3], 1 }
 0xacc   :  { %1728 = vsyncpa [#allocation6], 1 }
 0xacd   :  { %1729 = vsyncpa [#allocation9], 1 }
 0xace   :  { %1730 = vsyncpa [#allocation12], 1 }
 0xacf   :  { %1731 = vsyncpa [#allocation4], 1 }

</bundles_post_ra>
